<compile_context>
chip_gen: v7x
topology: tpu7x:2x2x1
jax: 0.10.0
libtpu: 0.0.40
codegen_flags: <defaults>
</compile_context>

<pallas_src>
import jax
import jax.numpy as jnp
import numpy as np
from jax.experimental import pallas as pl
from jax.experimental.pallas import tpu as pltpu

LANE = 128    # embed_dim padding -> lane-dense activations / output
ROWPAD = 32   # node-count padding (covers f32 sublane 8 and bf16 sublane 16)

# adjacency slots inside the stacked (11, NP, NP) operand
A_F1, A_B1, A_F2, A_B2, A_F3, A_B3, A_12, A_21, A_13, A_31, A_BW = range(11)


def _round_up(x, m):
    return (x + m - 1) // m * m


# --------------------------- shared forward math ----------------------------

def _forward_math(adj, feat, w, b_all, att, recip):
    """MAGNN_Agg forward on padded dense operands.

    `adj` (11,NP,NP) bf16, `feat` (4,NP,DP) bf16, `w` (5,DP,DP) bf16 (already
    transposed to (in,out)) may be Pallas refs (kernel path) or stacked arrays
    (reference path).  `b_all` / `att` are (8,DP) f32 values.  `recip`
    computes 1/x (exact or EUP-approx).
    """
    bf16, f32 = jnp.bfloat16, jnp.float32

    def mm(a, b):                       # MXU matmul: bf16 operands, f32 accum
        return jnp.dot(a, b, preferred_element_type=f32)

    def linear_relu(x_f32, k):          # relu(x @ W_k + b_k), W_k is (in,out)
        acc = jnp.dot(x_f32.astype(bf16), w[k], preferred_element_type=f32)
        return jnp.maximum(acc + b_all[k:k + 1, :], 0.0)

    x_a = feat[0]                                   # bf16: matmul RHS only
    x1 = feat[1].astype(f32)                        # element-wise use, hoisted
    x2 = feat[2].astype(f32)
    x3 = feat[3].astype(f32)

    # ---- one-hop metapaths: s-1-s, s-2-s, s-3-s -----------------------------
    net1 = (mm(adj[A_F1], x_a) + x1) * 0.5          # (msg_1 + x_list[1]) / 2
    net1_b = net1.astype(bf16)                      # hoisted: feeds 3 matmuls
    s1s = linear_relu(mm(adj[A_B1], net1_b), 0)
    net2 = (mm(adj[A_F2], x_a) + x2) * 0.5
    s2s = linear_relu(mm(adj[A_B2], net2.astype(bf16)), 1)
    net3 = (mm(adj[A_F3], x_a) + x3) * 0.5
    s3s = linear_relu(mm(adj[A_B3], net3.astype(bf16)), 2)

    # ---- two-hop metapath s-1-2-1-s (reuses net1 == net_msg1_s121s) ---------
    n12 = (mm(adj[A_12], net1_b) + x2) * 0.5
    n121 = (mm(adj[A_21], n12.astype(bf16)) + x1) * 0.5
    s121s = linear_relu(mm(adj[A_BW], n121.astype(bf16)), 3)

    # ---- two-hop metapath s-1-3-1-s -----------------------------------------
    n13 = (mm(adj[A_13], net1_b) + x3) * 0.5
    n131 = (mm(adj[A_31], n13.astype(bf16)) + x1) * 0.5
    s131s = linear_relu(mm(adj[A_BW], n131.astype(bf16)), 4)

    # TODO(synk): F.dropout on the five metapath embeddings is omitted
    # (deterministic inference path -- identity at eval time).

    # ---- attention softmax pooling over the 5 metapath embeddings -----------
    # NOTE: padded rows (>= real N_a) carry relu(bias)-style garbage through
    # this softmax; they are sliced off by the wrapper, so this is benign.
    xs = (s1s, s2s, s3s, s121s, s131s)
    scores = [jnp.sum(xs[k] * att[k:k + 1, :], axis=-1, keepdims=True)
              for k in range(5)]                    # 5 x (NP, 1)
    m = scores[0]
    for s in scores[1:]:
        m = jnp.maximum(m, s)
    es = [jnp.exp(s - m) for s in scores]
    inv = recip(es[0] + es[1] + es[2] + es[3] + es[4])
    acc = es[0] * xs[0]
    for k in range(1, 5):
        acc = acc + es[k] * xs[k]
    return acc * inv


# ------------------------------ Pallas kernel --------------------------------

def _magnn_fused_kernel(adj_ref, feat_ref, w_ref, b_ref, att_ref, out_ref):
    out_ref[...] = _forward_math(
        adj_ref, feat_ref, w_ref, b_ref[...], att_ref[...],
        lambda d: pl.reciprocal(d, approx=True))     # EUP slot, ~1e-3 rel err


def _fused_forward(adjs, feats, ws, bs, att):
    NP, DP = feats.shape[1], feats.shape[2]
    vmem = pl.BlockSpec(memory_space=pltpu.MemorySpace.VMEM)
    # Grid-less call: the whole padded working set (~0.25 MiB at these sizes)
    # is VMEM-resident; no tiling / per-step pipeline overhead is needed and
    # the output is a single lane-dense (NP, 128) f32 slab.
    return pl.pallas_call(
        _magnn_fused_kernel,
        out_shape=jax.ShapeDtypeStruct((NP, DP), jnp.float32),
        in_specs=[vmem] * 5,
        out_specs=vmem,
    )(adjs, feats, ws, bs, att)


# ------------------------------ plain-JAX glue --------------------------------

def _pad2(x, rows, cols):
    return jnp.pad(x, ((0, rows - x.shape[0]), (0, cols - x.shape[1])))


def _prepare_operands(params, x_list, edge_index_list, x_node, edge_weight_list,
                      edge_index_12, edge_index_13):
    e1, e2, e3 = edge_index_list[1], edge_index_list[2], edge_index_list[3]
    e12, e13 = edge_index_12, edge_index_13
    # Match PyTorch exactly: only when edge_weight_list[0] is None are ALL
    # weights replaced by ones; otherwise the supplied w1..w3 are used.
    if edge_weight_list[0] is None:
        edge_weight_list = [jnp.ones((e.shape[1],), jnp.float32)
                            for e in edge_index_list]
    w1, w2, w3 = edge_weight_list[1], edge_weight_list[2], edge_weight_list[3]

    x_a = x_node
    x1, x2, x3 = x_list[1], x_list[2], x_list[3]
    N_a, D = x_a.shape
    N1, N2, N3 = x1.shape[0], x2.shape[0], x3.shape[0]
    NP = _round_up(max(N_a, N1, N2, N3), ROWPAD)   # small row padding only
    DP = _round_up(D, LANE)                        # lane-dense embed dim

    E1, E2, E3 = e1.shape[1], e2.shape[1], e3.shape[1]
    E12, E13 = e12.shape[1], e13.shape[1]
    one1 = jnp.ones((E1,), jnp.float32)
    one2 = jnp.ones((E2,), jnp.float32)
    one3 = jnp.ones((E3,), jnp.float32)
    one12 = jnp.ones((E12,), jnp.float32)
    one13 = jnp.ones((E13,), jnp.float32)

    # Dense row-normalized adjacencies M such that M @ X reproduces
    # scatter_mean(w * X[src], dst).  All 11 are built with ONE scatter-add
    # into a pre-padded (11, NP, NP) buffer plus ONE count scatter.
    src_all = jnp.concatenate([e1[0], e1[1], e2[0], e2[1], e3[0], e3[1],
                               e12[0], e12[1], e13[0], e13[1], e1[1]])
    dst_all = jnp.concatenate([e1[1], e1[0], e2[1], e2[0], e3[1], e3[0],
                               e12[1], e12[0], e13[1], e13[0], e1[0]])
    w_all = jnp.concatenate([w1, one1, w2, one2, w3, one3,
                             one12, one12, one13, one13, w1])
    sizes = [E1, E1, E2, E2, E3, E3, E12, E12, E13, E13, E1]
    slot_all = jnp.concatenate(
        [jnp.full((n,), s, jnp.int32) for s, n in enumerate(sizes)])

    num = jnp.zeros((11, NP, NP), jnp.float32)
    num = num.at[slot_all, dst_all, src_all].add(w_all)
    cnt = jnp.zeros((11, NP), jnp.float32).at[slot_all, dst_all].add(1.0)
    adjs = (num / jnp.maximum(cnt, 1.0)[:, :, None]).astype(jnp.bfloat16)

    # Node features: bf16 storage halves the copy-in; element-wise math is
    # promoted back to f32 inside the kernel.
    feats = jnp.stack([_pad2(v, NP, DP)
                       for v in (x_a, x1, x2, x3)]).astype(jnp.bfloat16)

    names = ["s1s", "s2s", "s3s", "s121s", "s131s"]
    # nn.Linear stores (out, in); pre-transpose once host-side to (in, out) so
    # the in-kernel contraction is a straight jnp.dot (no transposed operand).
    ws = jnp.stack([_pad2(params["W_" + n].T, DP, DP)
                    for n in names]).astype(jnp.bfloat16)
    bs = jnp.zeros((8, DP), jnp.float32).at[:5, :D].set(
        jnp.stack([params["b_" + n] for n in names]))
    att = jnp.zeros((8, DP), jnp.float32).at[:5, :D].set(params["att_vec"])
    return adjs, feats, ws, bs, att, N_a, D


def magnn_agg(params, x_list, edge_index_list, x_node, edge_weight_list,
              edge_index_12, edge_index_13):
    """JAX/Pallas equivalent of MAGNN_Agg.forward (inference; dropout omitted)."""
    adjs, feats, ws, bs, att, N_a, D = _prepare_operands(
        params, x_list, edge_index_list, x_node, edge_weight_list,
        edge_index_12, edge_index_13)
    out = _fused_forward(adjs, feats, ws, bs, att)
    return out[:N_a, :D]


def _reference(adjs, feats, ws, bs, att):
    """Plain-JAX mirror of the fused kernel (same bf16 casts, exact divide)."""
    return _forward_math(adjs, feats, ws, bs, att, lambda d: 1.0 / d)


def init_params(key, embed_dim):
    keys = jax.random.split(key, 11)
    bound = 1.0 / float(np.sqrt(embed_dim))
    names = ["s1s", "s2s", "s3s", "s121s", "s131s"]
    p = {}
    for i, n in enumerate(names):
        p["W_" + n] = jax.random.uniform(keys[2 * i], (embed_dim, embed_dim),
                                         jnp.float32, -bound, bound)
        p["b_" + n] = jax.random.uniform(keys[2 * i + 1], (embed_dim,),
                                         jnp.float32, -bound, bound)
    a = float(np.sqrt(6.0 / (5 + embed_dim)))   # xavier_uniform_ on (5, D)
    p["att_vec"] = jax.random.uniform(keys[10], (5, embed_dim),
                                      jnp.float32, -a, a)
    return p


# ------------------------------------ main ------------------------------------

if __name__ == "__main__":
    key = jax.random.PRNGKey(0)
    D = 32
    N_a, N_p, N_t, N_c = 32, 24, 16, 16
    E_ap, E_at, E_ac, E_pt, E_pc = 64, 48, 40, 48, 40
    ks = jax.random.split(key, 24)

    x_a = jax.random.normal(ks[0], (N_a, D), jnp.float32)
    x_p = jax.random.normal(ks[1], (N_p, D), jnp.float32)
    x_t = jax.random.normal(ks[2], (N_t, D), jnp.float32)
    x_c = jax.random.normal(ks[3], (N_c, D), jnp.float32)
    x_list = [x_a, x_p, x_t, x_c]

    def edges(k1, k2, n_src, n_dst, n_e):
        return jnp.stack([jax.random.randint(k1, (n_e,), 0, n_src, jnp.int32),
                          jax.random.randint(k2, (n_e,), 0, n_dst, jnp.int32)])

    edge_index_list = [
        edges(ks[4], ks[5], N_a, N_a, 32),       # [0] unused by forward
        edges(ks[6], ks[7], N_a, N_p, E_ap),     # author <-> meta1 (papers)
        edges(ks[8], ks[9], N_a, N_t, E_at),     # author <-> meta2 (terms)
        edges(ks[10], ks[11], N_a, N_c, E_ac),   # author <-> meta3 (confs)
    ]
    edge_index_12 = edges(ks[12], ks[13], N_p, N_t, E_pt)   # meta1 <-> meta2
    edge_index_13 = edges(ks[14], ks[15], N_p, N_c, E_pc)   # meta1 <-> meta3
    edge_weight_list = [None, None, None, None]

    params = init_params(ks[20], D)

    h = jax.jit(magnn_agg)(params, x_list, edge_index_list, x_a,
                           edge_weight_list, edge_index_12, edge_index_13)
    jax.block_until_ready(h)
    assert h.shape == (N_a, D)

    # numerical sanity check vs. plain-JAX mirror (only diff: approx reciprocal)
    adjs, feats, ws, bs, att, _, _ = _prepare_operands(
        params, x_list, edge_index_list, x_a, edge_weight_list,
        edge_index_12, edge_index_13)
    ref = _reference(adjs, feats, ws, bs, att)[:N_a, :D]
    np.testing.assert_allclose(np.asarray(h), np.asarray(ref),
                               atol=5e-3, rtol=5e-3)
    print("KERNEL_OK")
</pallas_src>

<mosaic_0001>
module attributes {stable_mosaic.version = 11 : i64} {
  func.func private @main(%arg0: i32) attributes {dimension_semantics = [#tpu.dimension_semantics<core_parallel>], iteration_bounds = array<i64: 2>, tpu.core_type = #tpu.core_type<sc_scalar_subcore>, window_params = []} {
    return
  }
}

module attributes {stable_mosaic.version = 11 : i64} {
  func.func private @main(%arg0: i32) attributes {dimension_semantics = [#tpu.dimension_semantics<core_parallel>], iteration_bounds = array<i64: 2>, tpu.core_type = #tpu.core_type<sc_scalar_subcore>, window_params = []} {
    return
  }
}

module attributes {stable_mosaic.version = 11 : i64} {
  func.func @_magnn_fused_kernel(%arg0: memref<11x32x32xbf16, #tpu.memory_space<vmem>>, %arg1: memref<4x32x128xbf16, #tpu.memory_space<vmem>>, %arg2: memref<5x128x128xbf16, #tpu.memory_space<vmem>>, %arg3: memref<8x128xf32, #tpu.memory_space<vmem>>, %arg4: memref<8x128xf32, #tpu.memory_space<vmem>>, %arg5: memref<32x128xf32, #tpu.memory_space<vmem>>) attributes {dimension_semantics = [], scalar_prefetch = 0 : i64, scratch_operands = 0 : i64, tpu.core_type = #tpu.core_type<tc>} {
    %c0 = arith.constant 0 : index
    %c0_0 = arith.constant 0 : index
    %0 = vector.load %arg3[%c0, %c0_0] : memref<8x128xf32, #tpu.memory_space<vmem>>, vector<8x128xf32>
    %c0_1 = arith.constant 0 : index
    %c0_2 = arith.constant 0 : index
    %1 = vector.load %arg4[%c0_1, %c0_2] : memref<8x128xf32, #tpu.memory_space<vmem>>, vector<8x128xf32>
    %c0_3 = arith.constant 0 : index
    %c0_4 = arith.constant 0 : index
    %c0_5 = arith.constant 0 : index
    %2 = vector.load %arg1[%c0_3, %c0_4, %c0_5] : memref<4x32x128xbf16, #tpu.memory_space<vmem>>, vector<1x32x128xbf16>
    %3 = vector.shape_cast %2 : vector<1x32x128xbf16> to vector<32x128xbf16>
    %c1 = arith.constant 1 : index
    %c0_6 = arith.constant 0 : index
    %c0_7 = arith.constant 0 : index
    %4 = vector.load %arg1[%c1, %c0_6, %c0_7] : memref<4x32x128xbf16, #tpu.memory_space<vmem>>, vector<1x32x128xbf16>
    %5 = vector.shape_cast %4 : vector<1x32x128xbf16> to vector<32x128xbf16>
    %6 = arith.extf %5 : vector<32x128xbf16> to vector<32x128xf32>
    %c2 = arith.constant 2 : index
    %c0_8 = arith.constant 0 : index
    %c0_9 = arith.constant 0 : index
    %7 = vector.load %arg1[%c2, %c0_8, %c0_9] : memref<4x32x128xbf16, #tpu.memory_space<vmem>>, vector<1x32x128xbf16>
    %8 = vector.shape_cast %7 : vector<1x32x128xbf16> to vector<32x128xbf16>
    %9 = arith.extf %8 : vector<32x128xbf16> to vector<32x128xf32>
    %c3 = arith.constant 3 : index
    %c0_10 = arith.constant 0 : index
    %c0_11 = arith.constant 0 : index
    %10 = vector.load %arg1[%c3, %c0_10, %c0_11] : memref<4x32x128xbf16, #tpu.memory_space<vmem>>, vector<1x32x128xbf16>
    %11 = vector.shape_cast %10 : vector<1x32x128xbf16> to vector<32x128xbf16>
    %12 = arith.extf %11 : vector<32x128xbf16> to vector<32x128xf32>
    %c0_12 = arith.constant 0 : index
    %c0_13 = arith.constant 0 : index
    %c0_14 = arith.constant 0 : index
    %13 = vector.load %arg0[%c0_12, %c0_13, %c0_14] : memref<11x32x32xbf16, #tpu.memory_space<vmem>>, vector<1x32x32xbf16>
    %14 = vector.shape_cast %13 : vector<1x32x32xbf16> to vector<32x32xbf16>
    %cst = arith.constant dense<0.000000e+00> : vector<32x128xf32>
    %15 = tpu.matmul %14, %3, %cst {dimension_numbers = #tpu.dot_dimension_numbers<[1], [0], [0], [1], [0, 0, 1, 1], [], []>} : vector<32x32xbf16>, vector<32x128xbf16>, vector<32x128xf32> -> vector<32x128xf32>
    %16 = arith.addf %15, %6 : vector<32x128xf32>
    %cst_15 = arith.constant 5.000000e-01 : f32
    %17 = vector.broadcast %cst_15 : f32 to vector<32x128xf32>
    %18 = arith.mulf %16, %17 : vector<32x128xf32>
    %19 = arith.truncf %18 : vector<32x128xf32> to vector<32x128xbf16>
    %c1_16 = arith.constant 1 : index
    %c0_17 = arith.constant 0 : index
    %c0_18 = arith.constant 0 : index
    %20 = vector.load %arg0[%c1_16, %c0_17, %c0_18] : memref<11x32x32xbf16, #tpu.memory_space<vmem>>, vector<1x32x32xbf16>
    %21 = vector.shape_cast %20 : vector<1x32x32xbf16> to vector<32x32xbf16>
    %cst_19 = arith.constant dense<0.000000e+00> : vector<32x128xf32>
    %22 = tpu.matmul %21, %19, %cst_19 {dimension_numbers = #tpu.dot_dimension_numbers<[1], [0], [0], [1], [0, 0, 1, 1], [], []>} : vector<32x32xbf16>, vector<32x128xbf16>, vector<32x128xf32> -> vector<32x128xf32>
    %23 = arith.truncf %22 : vector<32x128xf32> to vector<32x128xbf16>
    %c0_20 = arith.constant 0 : index
    %c0_21 = arith.constant 0 : index
    %c0_22 = arith.constant 0 : index
    %24 = vector.load %arg2[%c0_20, %c0_21, %c0_22] : memref<5x128x128xbf16, #tpu.memory_space<vmem>>, vector<1x128x128xbf16>
    %25 = vector.shape_cast %24 : vector<1x128x128xbf16> to vector<128x128xbf16>
    %cst_23 = arith.constant dense<0.000000e+00> : vector<32x128xf32>
    %26 = tpu.matmul %23, %25, %cst_23 {dimension_numbers = #tpu.dot_dimension_numbers<[1], [0], [0], [1], [0, 0, 1, 1], [], []>} : vector<32x128xbf16>, vector<128x128xbf16>, vector<32x128xf32> -> vector<32x128xf32>
    %27 = vector.extract_strided_slice %0 {offsets = [0, 0], sizes = [1, 128], strides = [1, 1]} : vector<8x128xf32> to vector<1x128xf32>
    %28 = vector.broadcast %27 : vector<1x128xf32> to vector<32x128xf32>
    %29 = arith.addf %26, %28 : vector<32x128xf32>
    %cst_24 = arith.constant 0.000000e+00 : f32
    %30 = vector.broadcast %cst_24 : f32 to vector<32x128xf32>
    %31 = arith.maximumf %29, %30 : vector<32x128xf32>
    %c2_25 = arith.constant 2 : index
    %c0_26 = arith.constant 0 : index
    %c0_27 = arith.constant 0 : index
    %32 = vector.load %arg0[%c2_25, %c0_26, %c0_27] : memref<11x32x32xbf16, #tpu.memory_space<vmem>>, vector<1x32x32xbf16>
    %33 = vector.shape_cast %32 : vector<1x32x32xbf16> to vector<32x32xbf16>
    %cst_28 = arith.constant dense<0.000000e+00> : vector<32x128xf32>
    %34 = tpu.matmul %33, %3, %cst_28 {dimension_numbers = #tpu.dot_dimension_numbers<[1], [0], [0], [1], [0, 0, 1, 1], [], []>} : vector<32x32xbf16>, vector<32x128xbf16>, vector<32x128xf32> -> vector<32x128xf32>
    %35 = arith.addf %34, %9 : vector<32x128xf32>
    %cst_29 = arith.constant 5.000000e-01 : f32
    %36 = vector.broadcast %cst_29 : f32 to vector<32x128xf32>
    %37 = arith.mulf %35, %36 : vector<32x128xf32>
    %c3_30 = arith.constant 3 : index
    %c0_31 = arith.constant 0 : index
    %c0_32 = arith.constant 0 : index
    %38 = vector.load %arg0[%c3_30, %c0_31, %c0_32] : memref<11x32x32xbf16, #tpu.memory_space<vmem>>, vector<1x32x32xbf16>
    %39 = vector.shape_cast %38 : vector<1x32x32xbf16> to vector<32x32xbf16>
    %40 = arith.truncf %37 : vector<32x128xf32> to vector<32x128xbf16>
    %cst_33 = arith.constant dense<0.000000e+00> : vector<32x128xf32>
    %41 = tpu.matmul %39, %40, %cst_33 {dimension_numbers = #tpu.dot_dimension_numbers<[1], [0], [0], [1], [0, 0, 1, 1], [], []>} : vector<32x32xbf16>, vector<32x128xbf16>, vector<32x128xf32> -> vector<32x128xf32>
    %42 = arith.truncf %41 : vector<32x128xf32> to vector<32x128xbf16>
    %c1_34 = arith.constant 1 : index
    %c0_35 = arith.constant 0 : index
    %c0_36 = arith.constant 0 : index
    %43 = vector.load %arg2[%c1_34, %c0_35, %c0_36] : memref<5x128x128xbf16, #tpu.memory_space<vmem>>, vector<1x128x128xbf16>
    %44 = vector.shape_cast %43 : vector<1x128x128xbf16> to vector<128x128xbf16>
    %cst_37 = arith.constant dense<0.000000e+00> : vector<32x128xf32>
    %45 = tpu.matmul %42, %44, %cst_37 {dimension_numbers = #tpu.dot_dimension_numbers<[1], [0], [0], [1], [0, 0, 1, 1], [], []>} : vector<32x128xbf16>, vector<128x128xbf16>, vector<32x128xf32> -> vector<32x128xf32>
    %46 = vector.extract_strided_slice %0 {offsets = [1, 0], sizes = [1, 128], strides = [1, 1]} : vector<8x128xf32> to vector<1x128xf32>
    %47 = vector.broadcast %46 : vector<1x128xf32> to vector<32x128xf32>
    %48 = arith.addf %45, %47 : vector<32x128xf32>
    %cst_38 = arith.constant 0.000000e+00 : f32
    %49 = vector.broadcast %cst_38 : f32 to vector<32x128xf32>
    %50 = arith.maximumf %48, %49 : vector<32x128xf32>
    %c4 = arith.constant 4 : index
    %c0_39 = arith.constant 0 : index
    %c0_40 = arith.constant 0 : index
    %51 = vector.load %arg0[%c4, %c0_39, %c0_40] : memref<11x32x32xbf16, #tpu.memory_space<vmem>>, vector<1x32x32xbf16>
    %52 = vector.shape_cast %51 : vector<1x32x32xbf16> to vector<32x32xbf16>
    %cst_41 = arith.constant dense<0.000000e+00> : vector<32x128xf32>
    %53 = tpu.matmul %52, %3, %cst_41 {dimension_numbers = #tpu.dot_dimension_numbers<[1], [0], [0], [1], [0, 0, 1, 1], [], []>} : vector<32x32xbf16>, vector<32x128xbf16>, vector<32x128xf32> -> vector<32x128xf32>
    %54 = arith.addf %53, %12 : vector<32x128xf32>
    %cst_42 = arith.constant 5.000000e-01 : f32
    %55 = vector.broadcast %cst_42 : f32 to vector<32x128xf32>
    %56 = arith.mulf %54, %55 : vector<32x128xf32>
    %c5 = arith.constant 5 : index
    %c0_43 = arith.constant 0 : index
    %c0_44 = arith.constant 0 : index
    %57 = vector.load %arg0[%c5, %c0_43, %c0_44] : memref<11x32x32xbf16, #tpu.memory_space<vmem>>, vector<1x32x32xbf16>
    %58 = vector.shape_cast %57 : vector<1x32x32xbf16> to vector<32x32xbf16>
    %59 = arith.truncf %56 : vector<32x128xf32> to vector<32x128xbf16>
    %cst_45 = arith.constant dense<0.000000e+00> : vector<32x128xf32>
    %60 = tpu.matmul %58, %59, %cst_45 {dimension_numbers = #tpu.dot_dimension_numbers<[1], [0], [0], [1], [0, 0, 1, 1], [], []>} : vector<32x32xbf16>, vector<32x128xbf16>, vector<32x128xf32> -> vector<32x128xf32>
    %61 = arith.truncf %60 : vector<32x128xf32> to vector<32x128xbf16>
    %c2_46 = arith.constant 2 : index
    %c0_47 = arith.constant 0 : index
    %c0_48 = arith.constant 0 : index
    %62 = vector.load %arg2[%c2_46, %c0_47, %c0_48] : memref<5x128x128xbf16, #tpu.memory_space<vmem>>, vector<1x128x128xbf16>
    %63 = vector.shape_cast %62 : vector<1x128x128xbf16> to vector<128x128xbf16>
    %cst_49 = arith.constant dense<0.000000e+00> : vector<32x128xf32>
    %64 = tpu.matmul %61, %63, %cst_49 {dimension_numbers = #tpu.dot_dimension_numbers<[1], [0], [0], [1], [0, 0, 1, 1], [], []>} : vector<32x128xbf16>, vector<128x128xbf16>, vector<32x128xf32> -> vector<32x128xf32>
    %65 = vector.extract_strided_slice %0 {offsets = [2, 0], sizes = [1, 128], strides = [1, 1]} : vector<8x128xf32> to vector<1x128xf32>
    %66 = vector.broadcast %65 : vector<1x128xf32> to vector<32x128xf32>
    %67 = arith.addf %64, %66 : vector<32x128xf32>
    %cst_50 = arith.constant 0.000000e+00 : f32
    %68 = vector.broadcast %cst_50 : f32 to vector<32x128xf32>
    %69 = arith.maximumf %67, %68 : vector<32x128xf32>
    %c6 = arith.constant 6 : index
    %c0_51 = arith.constant 0 : index
    %c0_52 = arith.constant 0 : index
    %70 = vector.load %arg0[%c6, %c0_51, %c0_52] : memref<11x32x32xbf16, #tpu.memory_space<vmem>>, vector<1x32x32xbf16>
    %71 = vector.shape_cast %70 : vector<1x32x32xbf16> to vector<32x32xbf16>
    %cst_53 = arith.constant dense<0.000000e+00> : vector<32x128xf32>
    %72 = tpu.matmul %71, %19, %cst_53 {dimension_numbers = #tpu.dot_dimension_numbers<[1], [0], [0], [1], [0, 0, 1, 1], [], []>} : vector<32x32xbf16>, vector<32x128xbf16>, vector<32x128xf32> -> vector<32x128xf32>
    %73 = arith.addf %72, %9 : vector<32x128xf32>
    %cst_54 = arith.constant 5.000000e-01 : f32
    %74 = vector.broadcast %cst_54 : f32 to vector<32x128xf32>
    %75 = arith.mulf %73, %74 : vector<32x128xf32>
    %c7 = arith.constant 7 : index
    %c0_55 = arith.constant 0 : index
    %c0_56 = arith.constant 0 : index
    %76 = vector.load %arg0[%c7, %c0_55, %c0_56] : memref<11x32x32xbf16, #tpu.memory_space<vmem>>, vector<1x32x32xbf16>
    %77 = vector.shape_cast %76 : vector<1x32x32xbf16> to vector<32x32xbf16>
    %78 = arith.truncf %75 : vector<32x128xf32> to vector<32x128xbf16>
    %cst_57 = arith.constant dense<0.000000e+00> : vector<32x128xf32>
    %79 = tpu.matmul %77, %78, %cst_57 {dimension_numbers = #tpu.dot_dimension_numbers<[1], [0], [0], [1], [0, 0, 1, 1], [], []>} : vector<32x32xbf16>, vector<32x128xbf16>, vector<32x128xf32> -> vector<32x128xf32>
    %80 = arith.addf %79, %6 : vector<32x128xf32>
    %cst_58 = arith.constant 5.000000e-01 : f32
    %81 = vector.broadcast %cst_58 : f32 to vector<32x128xf32>
    %82 = arith.mulf %80, %81 : vector<32x128xf32>
    %c10 = arith.constant 10 : index
    %c0_59 = arith.constant 0 : index
    %c0_60 = arith.constant 0 : index
    %83 = vector.load %arg0[%c10, %c0_59, %c0_60] : memref<11x32x32xbf16, #tpu.memory_space<vmem>>, vector<1x32x32xbf16>
    %84 = vector.shape_cast %83 : vector<1x32x32xbf16> to vector<32x32xbf16>
    %85 = arith.truncf %82 : vector<32x128xf32> to vector<32x128xbf16>
    %cst_61 = arith.constant dense<0.000000e+00> : vector<32x128xf32>
    %86 = tpu.matmul %84, %85, %cst_61 {dimension_numbers = #tpu.dot_dimension_numbers<[1], [0], [0], [1], [0, 0, 1, 1], [], []>} : vector<32x32xbf16>, vector<32x128xbf16>, vector<32x128xf32> -> vector<32x128xf32>
    %87 = arith.truncf %86 : vector<32x128xf32> to vector<32x128xbf16>
    %c3_62 = arith.constant 3 : index
    %c0_63 = arith.constant 0 : index
    %c0_64 = arith.constant 0 : index
    %88 = vector.load %arg2[%c3_62, %c0_63, %c0_64] : memref<5x128x128xbf16, #tpu.memory_space<vmem>>, vector<1x128x128xbf16>
    %89 = vector.shape_cast %88 : vector<1x128x128xbf16> to vector<128x128xbf16>
    %cst_65 = arith.constant dense<0.000000e+00> : vector<32x128xf32>
    %90 = tpu.matmul %87, %89, %cst_65 {dimension_numbers = #tpu.dot_dimension_numbers<[1], [0], [0], [1], [0, 0, 1, 1], [], []>} : vector<32x128xbf16>, vector<128x128xbf16>, vector<32x128xf32> -> vector<32x128xf32>
    %91 = vector.extract_strided_slice %0 {offsets = [3, 0], sizes = [1, 128], strides = [1, 1]} : vector<8x128xf32> to vector<1x128xf32>
    %92 = vector.broadcast %91 : vector<1x128xf32> to vector<32x128xf32>
    %93 = arith.addf %90, %92 : vector<32x128xf32>
    %cst_66 = arith.constant 0.000000e+00 : f32
    %94 = vector.broadcast %cst_66 : f32 to vector<32x128xf32>
    %95 = arith.maximumf %93, %94 : vector<32x128xf32>
    %c8 = arith.constant 8 : index
    %c0_67 = arith.constant 0 : index
    %c0_68 = arith.constant 0 : index
    %96 = vector.load %arg0[%c8, %c0_67, %c0_68] : memref<11x32x32xbf16, #tpu.memory_space<vmem>>, vector<1x32x32xbf16>
    %97 = vector.shape_cast %96 : vector<1x32x32xbf16> to vector<32x32xbf16>
    %cst_69 = arith.constant dense<0.000000e+00> : vector<32x128xf32>
    %98 = tpu.matmul %97, %19, %cst_69 {dimension_numbers = #tpu.dot_dimension_numbers<[1], [0], [0], [1], [0, 0, 1, 1], [], []>} : vector<32x32xbf16>, vector<32x128xbf16>, vector<32x128xf32> -> vector<32x128xf32>
    %99 = arith.addf %98, %12 : vector<32x128xf32>
    %cst_70 = arith.constant 5.000000e-01 : f32
    %100 = vector.broadcast %cst_70 : f32 to vector<32x128xf32>
    %101 = arith.mulf %99, %100 : vector<32x128xf32>
    %c9 = arith.constant 9 : index
    %c0_71 = arith.constant 0 : index
    %c0_72 = arith.constant 0 : index
    %102 = vector.load %arg0[%c9, %c0_71, %c0_72] : memref<11x32x32xbf16, #tpu.memory_space<vmem>>, vector<1x32x32xbf16>
    %103 = vector.shape_cast %102 : vector<1x32x32xbf16> to vector<32x32xbf16>
    %104 = arith.truncf %101 : vector<32x128xf32> to vector<32x128xbf16>
    %cst_73 = arith.constant dense<0.000000e+00> : vector<32x128xf32>
    %105 = tpu.matmul %103, %104, %cst_73 {dimension_numbers = #tpu.dot_dimension_numbers<[1], [0], [0], [1], [0, 0, 1, 1], [], []>} : vector<32x32xbf16>, vector<32x128xbf16>, vector<32x128xf32> -> vector<32x128xf32>
    %106 = arith.addf %105, %6 : vector<32x128xf32>
    %cst_74 = arith.constant 5.000000e-01 : f32
    %107 = vector.broadcast %cst_74 : f32 to vector<32x128xf32>
    %108 = arith.mulf %106, %107 : vector<32x128xf32>
    %c10_75 = arith.constant 10 : index
    %c0_76 = arith.constant 0 : index
    %c0_77 = arith.constant 0 : index
    %109 = vector.load %arg0[%c10_75, %c0_76, %c0_77] : memref<11x32x32xbf16, #tpu.memory_space<vmem>>, vector<1x32x32xbf16>
    %110 = vector.shape_cast %109 : vector<1x32x32xbf16> to vector<32x32xbf16>
    %111 = arith.truncf %108 : vector<32x128xf32> to vector<32x128xbf16>
    %cst_78 = arith.constant dense<0.000000e+00> : vector<32x128xf32>
    %112 = tpu.matmul %110, %111, %cst_78 {dimension_numbers = #tpu.dot_dimension_numbers<[1], [0], [0], [1], [0, 0, 1, 1], [], []>} : vector<32x32xbf16>, vector<32x128xbf16>, vector<32x128xf32> -> vector<32x128xf32>
    %113 = arith.truncf %112 : vector<32x128xf32> to vector<32x128xbf16>
    %c4_79 = arith.constant 4 : index
    %c0_80 = arith.constant 0 : index
    %c0_81 = arith.constant 0 : index
    %114 = vector.load %arg2[%c4_79, %c0_80, %c0_81] : memref<5x128x128xbf16, #tpu.memory_space<vmem>>, vector<1x128x128xbf16>
    %115 = vector.shape_cast %114 : vector<1x128x128xbf16> to vector<128x128xbf16>
    %cst_82 = arith.constant dense<0.000000e+00> : vector<32x128xf32>
    %116 = tpu.matmul %113, %115, %cst_82 {dimension_numbers = #tpu.dot_dimension_numbers<[1], [0], [0], [1], [0, 0, 1, 1], [], []>} : vector<32x128xbf16>, vector<128x128xbf16>, vector<32x128xf32> -> vector<32x128xf32>
    %117 = vector.extract_strided_slice %0 {offsets = [4, 0], sizes = [1, 128], strides = [1, 1]} : vector<8x128xf32> to vector<1x128xf32>
    %118 = vector.broadcast %117 : vector<1x128xf32> to vector<32x128xf32>
    %119 = arith.addf %116, %118 : vector<32x128xf32>
    %cst_83 = arith.constant 0.000000e+00 : f32
    %120 = vector.broadcast %cst_83 : f32 to vector<32x128xf32>
    %121 = arith.maximumf %119, %120 : vector<32x128xf32>
    %122 = vector.extract_strided_slice %1 {offsets = [0, 0], sizes = [1, 128], strides = [1, 1]} : vector<8x128xf32> to vector<1x128xf32>
    %123 = vector.broadcast %122 : vector<1x128xf32> to vector<32x128xf32>
    %124 = arith.mulf %31, %123 : vector<32x128xf32>
    %cst_84 = arith.constant dense<0.000000e+00> : vector<32xf32>
    %125 = vector.multi_reduction <add>, %124, %cst_84 [1] : vector<32x128xf32> to vector<32xf32>
    %126 = vector.shape_cast %125 : vector<32xf32> to vector<32x1xf32>
    %127 = vector.extract_strided_slice %1 {offsets = [1, 0], sizes = [1, 128], strides = [1, 1]} : vector<8x128xf32> to vector<1x128xf32>
    %128 = vector.broadcast %127 : vector<1x128xf32> to vector<32x128xf32>
    %129 = arith.mulf %50, %128 : vector<32x128xf32>
    %cst_85 = arith.constant dense<0.000000e+00> : vector<32xf32>
    %130 = vector.multi_reduction <add>, %129, %cst_85 [1] : vector<32x128xf32> to vector<32xf32>
    %131 = vector.shape_cast %130 : vector<32xf32> to vector<32x1xf32>
    %132 = vector.extract_strided_slice %1 {offsets = [2, 0], sizes = [1, 128], strides = [1, 1]} : vector<8x128xf32> to vector<1x128xf32>
    %133 = vector.broadcast %132 : vector<1x128xf32> to vector<32x128xf32>
    %134 = arith.mulf %69, %133 : vector<32x128xf32>
    %cst_86 = arith.constant dense<0.000000e+00> : vector<32xf32>
    %135 = vector.multi_reduction <add>, %134, %cst_86 [1] : vector<32x128xf32> to vector<32xf32>
    %136 = vector.shape_cast %135 : vector<32xf32> to vector<32x1xf32>
    %137 = vector.extract_strided_slice %1 {offsets = [3, 0], sizes = [1, 128], strides = [1, 1]} : vector<8x128xf32> to vector<1x128xf32>
    %138 = vector.broadcast %137 : vector<1x128xf32> to vector<32x128xf32>
    %139 = arith.mulf %95, %138 : vector<32x128xf32>
    %cst_87 = arith.constant dense<0.000000e+00> : vector<32xf32>
    %140 = vector.multi_reduction <add>, %139, %cst_87 [1] : vector<32x128xf32> to vector<32xf32>
    %141 = vector.shape_cast %140 : vector<32xf32> to vector<32x1xf32>
    %142 = vector.extract_strided_slice %1 {offsets = [4, 0], sizes = [1, 128], strides = [1, 1]} : vector<8x128xf32> to vector<1x128xf32>
    %143 = vector.broadcast %142 : vector<1x128xf32> to vector<32x128xf32>
    %144 = arith.mulf %121, %143 : vector<32x128xf32>
    %cst_88 = arith.constant dense<0.000000e+00> : vector<32xf32>
    %145 = vector.multi_reduction <add>, %144, %cst_88 [1] : vector<32x128xf32> to vector<32xf32>
    %146 = vector.shape_cast %145 : vector<32xf32> to vector<32x1xf32>
    %147 = arith.maximumf %126, %131 : vector<32x1xf32>
    %148 = arith.maximumf %147, %136 : vector<32x1xf32>
    %149 = arith.maximumf %148, %141 : vector<32x1xf32>
    %150 = arith.maximumf %149, %146 : vector<32x1xf32>
    %151 = arith.subf %126, %150 : vector<32x1xf32>
    %152 = math.exp %151 : vector<32x1xf32>
    %153 = arith.subf %131, %150 : vector<32x1xf32>
    %154 = math.exp %153 : vector<32x1xf32>
    %155 = arith.subf %136, %150 : vector<32x1xf32>
    %156 = math.exp %155 : vector<32x1xf32>
    %157 = arith.subf %141, %150 : vector<32x1xf32>
    %158 = math.exp %157 : vector<32x1xf32>
    %159 = arith.subf %146, %150 : vector<32x1xf32>
    %160 = math.exp %159 : vector<32x1xf32>
    %161 = arith.addf %152, %154 : vector<32x1xf32>
    %162 = arith.addf %161, %156 : vector<32x1xf32>
    %163 = arith.addf %162, %158 : vector<32x1xf32>
    %164 = arith.addf %163, %160 : vector<32x1xf32>
    %165 = tpu.reciprocal %164 {approx = true} : vector<32x1xf32> -> vector<32x1xf32>
    %166 = vector.broadcast %152 : vector<32x1xf32> to vector<32x128xf32>
    %167 = arith.mulf %166, %31 : vector<32x128xf32>
    %168 = vector.broadcast %154 : vector<32x1xf32> to vector<32x128xf32>
    %169 = arith.mulf %168, %50 : vector<32x128xf32>
    %170 = arith.addf %167, %169 : vector<32x128xf32>
    %171 = vector.broadcast %156 : vector<32x1xf32> to vector<32x128xf32>
    %172 = arith.mulf %171, %69 : vector<32x128xf32>
    %173 = arith.addf %170, %172 : vector<32x128xf32>
    %174 = vector.broadcast %158 : vector<32x1xf32> to vector<32x128xf32>
    %175 = arith.mulf %174, %95 : vector<32x128xf32>
    %176 = arith.addf %173, %175 : vector<32x128xf32>
    %177 = vector.broadcast %160 : vector<32x1xf32> to vector<32x128xf32>
    %178 = arith.mulf %177, %121 : vector<32x128xf32>
    %179 = arith.addf %176, %178 : vector<32x128xf32>
    %180 = vector.broadcast %165 : vector<32x1xf32> to vector<32x128xf32>
    %181 = arith.mulf %179, %180 : vector<32x128xf32>
    %c0_89 = arith.constant 0 : index
    %c0_90 = arith.constant 0 : index
    %182 = vector.load %arg5[%c0_89, %c0_90] : memref<32x128xf32, #tpu.memory_space<vmem>>, vector<32x128xf32>
    tpu.vector_store %arg5[%c0_89, %c0_90], %181 {strides = array<i32>} : memref<32x128xf32, #tpu.memory_space<vmem>>, vector<32x128xf32>,
    return
  }
}

</mosaic_0001>

<bundles_post_ra>
// kernel: magnn_agg.1
= control target key start
LH: loop header
LB: loop body
LE: loop exit
PB: predicated region body
PF: predicated region fallthrough
CT: control target
= control target key end

     0   :  { %vm81_vm0 = vcmask 261120   ;;  %s3036_s0 = inlined_call_operand.vmem [shape: bf16[11,32,32], index: 0, kind: input, shape index: {}]   ;;  %s3037_s1 = inlined_call_operand.vmem [shape: bf16[4,32,128], index: 1, kind: input, shape index: {}]   ;;  %s3038_s2 = inlined_call_operand.vmem [shape: bf16[5,128,128], index: 2, kind: input, shape index: {}]   ;;  %s3039_s3 = inlined_call_operand.vmem [shape: f32[8,128], index: 3, kind: input, shape index: {}]   ;;  %s3040_s4 = inlined_call_operand.vmem [shape: f32[8,128], index: 4, kind: input, shape index: {}]   ;;  %s3041_s5 = inlined_call_operand.hbm [shape: f32[32,128], index: 5, kind: output, shape index: {}]  }
   0x1   :  { %v2486_v0 = vld [vmem:[%s3037_s1] sm:$0xff]   ;;  %v2491_v1 = vld [vmem:[%s3037_s1 + $0x8] sm:$0xff]  }
   0x2   :  { %2115 = vmatprep.subr.bf16.mxu1 %v2486_v0  ;;  %v2316_v2 = vld [vmem:[%s3036_s0] sm:$0xff]   ;;  %v2317_v3 = vld [vmem:[%s3036_s0 + $0x8] sm:$0xff]  }
   0x3   :  { %2116 = vmatpush3.bf16.msra.mxu1 %v2486_v0  ;;  %2119 = vmatprep.mubr.msk.bf16.mxu1 %vm81_vm0, %v2316_v2 }
   0x4   :  { %2117 = vmatprep.subr.bf16.mxu1 %v2491_v1 }
   0x7   :  { %2118 = vmatpush3.bf16.msra.mxu1 %v2491_v1 }
   0xa   :  { %2120 = vmatmul.mubr.msk.bf16.vlgmr.msra.gmra.mrb[0].mxu1 %vm81_vm0, %v2317_v3 }
   0xb   :  { %10 = vsyncpa [#allocation3], 0  ;;  %v2318_v4 = vld [vmem:[%s3036_s0 + $0x10] sm:$0xff]   ;;  %v2322_v5 = vld [vmem:[%s3038_s2] sm:$0xff]  }
   0xc   :  { %2127 = vmatprep.mubr.msk.bf16.mxu1 %vm81_vm0, %v2318_v4  ;;  %v2323_v6 = vld [vmem:[%s3038_s2 + $0x8] sm:$0xff]   ;;  %2131 = vmatprep.subr.bf16.mxu0 %v2322_v5  ;;  %v2324_v7 = vld [vmem:[%s3038_s2 + $0x10] sm:$0xff]   ;;  %v2325_v8 = vld [vmem:[%s3038_s2 + $0x18] sm:$0xff]  }
   0xd   :  { %2132 = vmatpush3.bf16.msra.mxu0 %v2322_v5  ;;  %v2326_v9 = vld [vmem:[%s3038_s2 + $0x20] sm:$0xff]   ;;  %v2327_v10 = vld [vmem:[%s3038_s2 + $0x28] sm:$0xff]   ;;  %v2328_v11 = vld [vmem:[%s3038_s2 + $0x30] sm:$0xff]  }
   0xe   :  { %2133 = vmatprep.subr.bf16.mxu0 %v2323_v6  ;;  %v2012_v12 = vld [vmem:[%s3037_s1 + $0x18] sm:$0xff]   ;;  %v2011_v13 = vld [vmem:[%s3037_s1 + $0x10] sm:$0xff]   ;;  %v2320_v33 = vld [vmem:[%s3036_s0 + $0x20] sm:$0xff]  }
   0xf   :  { %v2536_v14 = vunpack.c.l.bf16 %v2012_v12  ;;  %v2538_v15 = vunpack.c.l.bf16 %v2011_v13  ;;  %v2540_v16 = vunpack.c.h.bf16 %v2012_v12  ;;  %v2542_v18 = vunpack.c.h.bf16 %v2011_v13  ;;  %v2319_v32 = vld [vmem:[%s3036_s0 + $0x18] sm:$0xff]   ;;  %v2321_v34 = vld [vmem:[%s3036_s0 + $0x28] sm:$0xff]   ;;  %v2330_v36 = vld [vmem:[%s3036_s0 + $0x30] sm:$0xff]  }
  0x10   :  { %v2329_v35 = vld [vmem:[%s3038_s2 + $0x38] sm:$0xff]   ;;  %v2582_v40 = vld [vmem:[%s3037_s1 + $0x28] sm:$0xff]   ;;  %v2587_v43 = vld [vmem:[%s3037_s1 + $0x20] sm:$0xff]  }
  0x11   :  { %2134 = vmatpush3.bf16.msra.mxu0 %v2323_v6  ;;  %v2001_v45 = vunpack.c.l.bf16 %v2582_v40  ;;  %v1997_v46 = vunpack.c.l.bf16 %v2587_v43  ;;  %v2002_v47 = vunpack.c.h.bf16 %v2582_v40  ;;  %v1998_v49 = vunpack.c.h.bf16 %v2587_v43  ;;  %v2332_v63 = vld [vmem:[%s3038_s2 + $0x40] sm:$0xff]   ;;  %v2331_v2 = vld [vmem:[%s3036_s0 + $0x38] sm:$0xff]   ;;  %v2333_v3 = vld [vmem:[%s3038_s2 + $0x48] sm:$0xff]  }
  0x12   :  { %2135 = vmatprep.subr.bf16.mxu0 %v2324_v7  ;;  %v2334_v4 = vld [vmem:[%s3038_s2 + $0x50] sm:$0xff]   ;;  %v2335_v5 = vld [vmem:[%s3038_s2 + $0x58] sm:$0xff]   ;;  %v2336_v6 = vld [vmem:[%s3038_s2 + $0x60] sm:$0xff]  }
  0x13   :  { %v2636_v13 = vld [vmem:[%s3039_s3] sm:$0xff]  ;;  %v2347_v43 = vld [vmem:[%s3038_s2 + $0x88] sm:$0xff]  }
  0x15   :  { %2136 = vmatpush3.bf16.msra.mxu0 %v2324_v7  ;;  %v2337_v7 = vld [vmem:[%s3038_s2 + $0x68] sm:$0xff]  }
  0x16   :  { %2137 = vmatprep.subr.bf16.mxu0 %v2325_v8 }
  0x19   :  { %2138 = vmatpush3.bf16.msra.mxu0 %v2325_v8  ;;  %v2338_v8 = vld [vmem:[%s3038_s2 + $0x70] sm:$0xff]  }
  0x1a   :  { %2139 = vmatprep.subr.bf16.mxu0 %v2326_v9 }
  0x1d   :  { %2140 = vmatpush3.bf16.msra.mxu0 %v2326_v9  ;;  %v2339_v9 = vld [vmem:[%s3038_s2 + $0x78] sm:$0xff]  }
  0x1e   :  { %2141 = vmatprep.subr.bf16.mxu0 %v2327_v10 }
  0x21   :  { %2142 = vmatpush3.bf16.msra.mxu0 %v2327_v10  ;;  %v231_v10 = vlaneseq }
  0x22   :  { %2143 = vmatprep.subr.bf16.mxu0 %v2328_v11 }
  0x25   :  { %2144 = vmatpush3.bf16.msra.mxu0 %v2328_v11  ;;  %v2630_v11 = vshrl.u32 %v231_v10, 7 }
  0x26   :  { %2145 = vmatprep.subr.bf16.mxu0 %v2329_v35 }
  0x27   :  { %v233_v12 = vsub.s32 0, %v2630_v11 }
  0x29   :  { %2146 = vmatpush3.bf16.msra.mxu0 %v2329_v35 }
  0xdd   :  { %v2121_v17 = vpop.f32.mrb[0].mxu1 }
  0xde   :  { %v131_v19 = vadd.f32 %v2121_v17, %v2536_v14  ;;  %v122_v20 = vpop.f32.mrb[1].mxu1  ;;  %v234_v17 = vrot.slane %v2636_v13, %v233_v12 }
  0xdf   :  { %v123_v21 = vadd.f32 %v2538_v15, %v122_v20  ;;  %v2122_v22 = vpop.f32.mrb[2].mxu1 }
  0xe0   :  { %v134_v23 = vadd.f32 %v2122_v22, %v2540_v16  ;;  %v125_v24 = vpop.f32.mrb[3].mxu1  ;;  %v139_v26 = vmul.f32 0.5, %v131_v19  ;;  %v2642_v19 = vld [vmem:[%s3040_s4] sm:$0xff] }
  0xe1   :  { %v126_v25 = vadd.f32 %v2542_v18, %v125_v24  ;;  %v137_v28 = vmul.f32 0.5, %v123_v21 }
  0xe2   :  { %v140_v27 = vmul.f32 0.5, %v134_v23  ;;  %v1550_v23 = vrot.slane %v2642_v19, %v233_v12 }
  0xe3   :  { %v138_v29 = vmul.f32 0.5, %v126_v25 }
  0xe4   :  { %v2548_v30 = vpack.c.bf16 %v140_v27, %v139_v26 }
  0xe5   :  { %v2550_v31 = vpack.c.bf16 %v138_v29, %v137_v28 }
  0xe7   :  { %2123 = vmatprep.subr.bf16.mxu1 %v2550_v31 }
  0xe8   :  { %2124 = vmatpush3.bf16.msra.mxu1 %v2550_v31 }
  0xe9   :  { %2125 = vmatprep.subr.bf16.mxu1 %v2548_v30 }
  0xec   :  { %2126 = vmatpush3.bf16.msra.mxu1 %v2548_v30 }
  0xed   :  { %2151 = vmatprep.subr.bf16.mxu1 %v2486_v0 }
  0xef   :  { %2128 = vmatmul.mubr.msk.bf16.vlgmr.msra.gmra.mrb[4].mxu1 %vm81_vm0, %v2319_v32 }
  0xf0   :  { %2152 = vmatpush3.bf16.msra.mxu1 %v2486_v0  ;;  %2155 = vmatprep.mubr.msk.bf16.mxu1 %vm81_vm0, %v2320_v33 }
  0xf1   :  { %2153 = vmatprep.subr.bf16.mxu1 %v2491_v1 }
  0xf4   :  { %2154 = vmatpush3.bf16.msra.mxu1 %v2491_v1 }
  0xf7   :  { %2156 = vmatmul.mubr.msk.bf16.vlgmr.msra.gmra.mrb[8].mxu1 %vm81_vm0, %v2321_v34 }
  0xf8   :  { %2163 = vmatprep.mubr.msk.bf16.mxu1 %vm81_vm0, %v2330_v36 }
 0x1c2   :  { %v2129_v37 = vpop.f32.mrb[4].mxu1 }
 0x1c3   :  { %v198_v38 = vpop.f32.mrb[5].mxu1 }
 0x1c4   :  { %v2130_v39 = vpop.f32.mrb[6].mxu1 }
 0x1c5   :  { %v214_v41 = vpack.c.bf16 %v2130_v39, %v2129_v37  ;;  %v201_v42 = vpop.f32.mrb[7].mxu1 }
 0x1c6   :  { %v213_v44 = vpack.c.bf16 %v201_v42, %v198_v38 }
 0x1c8   :  { %2147 = vmatprep.mubr.bf16.mxu0 %v213_v44 }
 0x1c9   :  { %2148 = vmatmul.mubr.bf16.vlgmr.msra.gmra.mrb[0].mxu0 %v214_v41 }
 0x1ca   :  { %v2157_v48 = vpop.f32.mrb[8].mxu1 }
 0x1cb   :  { %v400_v50 = vadd.f32 %v2157_v48, %v2001_v45  ;;  %v391_v51 = vpop.f32.mrb[9].mxu1 }
 0x1cc   :  { %v392_v52 = vadd.f32 %v1997_v46, %v391_v51  ;;  %v2158_v53 = vpop.f32.mrb[10].mxu1  ;;  %v2340_v51 = vld [vmem:[%s3036_s0 + $0x40] sm:$0xff]  }
 0x1cd   :  { %v403_v54 = vadd.f32 %v2158_v53, %v2002_v47  ;;  %v394_v55 = vpop.f32.mrb[11].mxu1  ;;  %v408_v57 = vmul.f32 0.5, %v400_v50  ;;  %v2342_v53 = vld [vmem:[%s3036_s0 + $0x60] sm:$0xff]  }
 0x1ce   :  { %v395_v56 = vadd.f32 %v1998_v49, %v394_v55  ;;  %v406_v59 = vmul.f32 0.5, %v392_v52  ;;  %v2341_v52 = vld [vmem:[%s3036_s0 + $0x48] sm:$0xff]   ;;  %v503_v55 = vsub.s32 1, %v2630_v11 }
 0x1cf   :  { %v409_v58 = vmul.f32 0.5, %v403_v54  ;;  %v2348_v54 = vld [vmem:[%s3036_s0 + $0x70] sm:$0xff]  }
 0x1d0   :  { %v407_v60 = vmul.f32 0.5, %v395_v56  ;;  %v504_v56 = vrot.slane %v2636_v13, %v503_v55 }
 0x1d1   :  { %v416_v61 = vpack.c.bf16 %v409_v58, %v408_v57 }
 0x1d2   :  { %v415_v62 = vpack.c.bf16 %v407_v60, %v406_v59  ;;  %v1566_v60 = vrot.slane %v2642_v19, %v503_v55 }
 0x1d4   :  { %2159 = vmatprep.subr.bf16.mxu1 %v415_v62 }
 0x1d5   :  { %2160 = vmatpush3.bf16.msra.mxu1 %v415_v62 }
 0x1d6   :  { %2161 = vmatprep.subr.bf16.mxu1 %v416_v61 }
 0x1d9   :  { %2162 = vmatpush3.bf16.msra.mxu1 %v416_v61 }
 0x1da   :  { %2167 = vmatprep.subr.bf16.mxu1 %v2332_v63 }
 0x1dc   :  { %2164 = vmatmul.mubr.msk.bf16.vlgmr.msra.gmra.mrb[12].mxu1 %vm81_vm0, %v2331_v2 }
 0x1dd   :  { %2168 = vmatpush3.bf16.msra.mxu1 %v2332_v63  ;;  %v2706_v63 = vld [vmem:[%s3037_s1 + $0x38] sm:$0xff]  }
 0x1de   :  { %2169 = vmatprep.subr.bf16.mxu1 %v2333_v3  ;;  %v2009_v10 = vunpack.c.l.bf16 %v2706_v63 }
 0x1e1   :  { %2170 = vmatpush3.bf16.msra.mxu1 %v2333_v3 }
 0x1e2   :  { %2171 = vmatprep.subr.bf16.mxu1 %v2334_v4 }
 0x1e5   :  { %2172 = vmatpush3.bf16.msra.mxu1 %v2334_v4 }
 0x1e6   :  { %2173 = vmatprep.subr.bf16.mxu1 %v2335_v5 }
 0x1e9   :  { %2174 = vmatpush3.bf16.msra.mxu1 %v2335_v5  ;;  %v2714_v5 = vld [vmem:[%s3037_s1 + $0x30] sm:$0xff]  }
 0x1ea   :  { %2175 = vmatprep.subr.bf16.mxu1 %v2336_v6  ;;  %v2005_v12 = vunpack.c.l.bf16 %v2714_v5 }
 0x1ed   :  { %2176 = vmatpush3.bf16.msra.mxu1 %v2336_v6 }
 0x1ee   :  { %2177 = vmatprep.subr.bf16.mxu1 %v2337_v7 }
 0x1f1   :  { %2178 = vmatpush3.bf16.msra.mxu1 %v2337_v7 }
 0x1f2   :  { %2179 = vmatprep.subr.bf16.mxu1 %v2338_v8 }
 0x1f5   :  { %2180 = vmatpush3.bf16.msra.mxu1 %v2338_v8 }
 0x1f6   :  { %2181 = vmatprep.subr.bf16.mxu1 %v2339_v9 }
 0x1f9   :  { %2182 = vmatpush3.bf16.msra.mxu1 %v2339_v9 }
 0x1fa   :  { %2187 = vmatprep.subr.bf16.mxu1 %v2486_v0 }
 0x29c   :  { %v2149_v20 = vpop.f32.mrb[0].mxu0 }
 0x29d   :  { %v2644_v21 = vadd.f32 %v2149_v20, %v234_v17  ;;  %v317_v22 = vpop.f32.mrb[1].mxu0 }
 0x29e   :  { %v2647_v24 = vadd.f32 %v317_v22, %v234_v17  ;;  %v2150_v25 = vpop.f32.mrb[2].mxu0  ;;  %v2010_v22 = vunpack.c.h.bf16 %v2706_v63 }
 0x29f   :  { %v3055_v26 = vmax.f32 %v2644_v21, 0.0  ;;  %v2650_v27 = vadd.f32 %v2150_v25, %v234_v17  ;;  %v320_v28 = vpop.f32.mrb[3].mxu0  ;;  %v2006_v25 = vunpack.c.h.bf16 %v2714_v5  ;;  %v2369_v5 = vld [vmem:[%s3036_s0 + $0x98] sm:$0xff]  }
 0x2a0   :  { %v332_v29 = vmax.f32 %v2647_v24, 0.0  ;;  %v2653_v32 = vadd.f32 %v320_v28, %v234_v17 }
 0x2a1   :  { %v3050_v33 = vmax.f32 %v2650_v27, 0.0  ;;  %v1553_v34 = vmul.f32 %v1550_v23, %v3055_v26 }
 0x2a2   :  { %v333_v35 = vmax.f32 %v2653_v32, 0.0  ;;  %v1551_v36 = vmul.f32 %v1550_v23, %v332_v29 }
 0x2a3   :  { %1559 = vadd.xlane.f32.xlu1 %v1553_v34  ;;  %v1554_v37 = vmul.f32 %v1550_v23, %v3050_v33 }
 0x2a4   :  { %1555 = vadd.xlane.f32.xlu0 %v1551_v36  ;;  %v1552_v38 = vmul.f32 %v1550_v23, %v333_v35 }
 0x2a7   :  { %1561 = vadd.xlane.f32.xlu1 %v1554_v37 }
 0x2a8   :  { %1557 = vadd.xlane.f32.xlu0 %v1552_v38 }
 0x2af   :  { %v2165_v39 = vpop.f32.mrb[12].mxu1 }
 0x2b0   :  { %v467_v41 = vpop.f32.mrb[13].mxu1 }
 0x2b1   :  { %v2166_v42 = vpop.f32.mrb[14].mxu1 }
 0x2b2   :  { %v483_v44 = vpack.c.bf16 %v2166_v42, %v2165_v39  ;;  %v470_v48 = vpop.f32.mrb[15].mxu1 }
 0x2b3   :  { %v482_v50 = vpack.c.bf16 %v470_v48, %v467_v41 }
 0x2b5   :  { %2183 = vmatprep.mubr.bf16.mxu1 %v482_v50 }
 0x2b6   :  { %2184 = vmatmul.mubr.bf16.vlgmr.msra.gmra.mrb[16].mxu1 %v483_v44 }
 0x2b7   :  { %2188 = vmatpush3.bf16.msra.mxu1 %v2486_v0  ;;  %2191 = vmatprep.mubr.msk.bf16.mxu1 %vm81_vm0, %v2340_v51  ;;  %v2343_v0 = vld [vmem:[%s3036_s0 + $0x68] sm:$0xff]  }
 0x2b8   :  { %2189 = vmatprep.subr.bf16.mxu1 %v2491_v1 }
 0x2bb   :  { %2190 = vmatpush3.bf16.msra.mxu1 %v2491_v1  ;;  %v2344_v1 = vld [vmem:[%s3036_s0 + $0x50] sm:$0xff]  }
 0x2bc   :  { %2223 = vmatprep.subr.bf16.mxu1 %v2550_v31  ;;  %2199 = vmatprep.mubr.msk.bf16.mxu0 %vm81_vm0, %v2344_v1 }
 0x2be   :  { %2192 = vmatmul.mubr.msk.bf16.vlgmr.msra.gmra.mrb[20].mxu1 %vm81_vm0, %v2341_v52 }
 0x2bf   :  { %2224 = vmatpush3.bf16.msra.mxu1 %v2550_v31  ;;  %2227 = vmatprep.mubr.msk.bf16.mxu1 %vm81_vm0, %v2342_v53 }
 0x2c0   :  { %2225 = vmatprep.subr.bf16.mxu1 %v2548_v30 }
 0x2c3   :  { %2226 = vmatpush3.bf16.msra.mxu1 %v2548_v30 }
 0x2c6   :  { %2228 = vmatmul.mubr.msk.bf16.vlgmr.msra.gmra.mrb[24].mxu1 %vm81_vm0, %v2343_v0 }
 0x2c7   :  { %2235 = vmatprep.mubr.msk.bf16.mxu1 %vm81_vm0, %v2348_v54 }
 0x389   :  { %v2185_v57 = vpop.f32.mrb[16].mxu1 }
 0x38a   :  { %v2698_v58 = vadd.f32 %v2185_v57, %v504_v56  ;;  %v587_v59 = vpop.f32.mrb[17].mxu1 }
 0x38b   :  { %v2701_v61 = vadd.f32 %v587_v59, %v504_v56  ;;  %v2186_v62 = vpop.f32.mrb[18].mxu1 }
 0x38c   :  { %v3054_v2 = vmax.f32 %v2698_v58, 0.0  ;;  %v2709_v3 = vadd.f32 %v2186_v62, %v504_v56  ;;  %v590_v4 = vpop.f32.mrb[19].mxu1 }
 0x38d   :  { %v2716_v6 = vadd.f32 %v590_v4, %v504_v56  ;;  %v602_v7 = vmax.f32 %v2701_v61, 0.0 }
 0x38e   :  { %v3049_v8 = vmax.f32 %v2709_v3, 0.0  ;;  %v1569_v9 = vmul.f32 %v1566_v60, %v3054_v2 }
 0x38f   :  { %v603_v17 = vmax.f32 %v2716_v6, 0.0  ;;  %v1567_v36 = vmul.f32 %v1566_v60, %v602_v7 }
 0x390   :  { %1575 = vadd.xlane.f32.xlu0 %v1569_v9  ;;  %v1570_v20 = vmul.f32 %v1566_v60, %v3049_v8 }
 0x391   :  { %v2193_v23 = vpop.f32.mrb[20].mxu1  ;;  %v1568_v42 = vmul.f32 %v1566_v60, %v603_v17 }
 0x392   :  { %v670_v28 = vadd.f32 %v2193_v23, %v2009_v10  ;;  %v661_v34 = vpop.f32.mrb[21].mxu1  ;;  %1577 = vadd.xlane.f32.xlu1 %v1570_v20 }
 0x393   :  { %v662_v37 = vadd.f32 %v2005_v12, %v661_v34  ;;  %v2194_v38 = vpop.f32.mrb[22].mxu1  ;;  %v2351_v34 = vld [vmem:[%s3038_s2 + $0x98] sm:$0xff]  }
 0x394   :  { %v673_v39 = vadd.f32 %v2194_v38, %v2010_v22  ;;  %v664_v41 = vpop.f32.mrb[23].mxu1  ;;  %1571 = vadd.xlane.f32.xlu0 %v1567_v36  ;;  %v678_v48 = vmul.f32 0.5, %v670_v28  ;;  %v2352_v36 = vld [vmem:[%s3038_s2 + $0xa0] sm:$0xff]   ;;  %v2354_v38 = vld [vmem:[%s3038_s2 + $0xb0] sm:$0xff]  }
 0x395   :  { %v665_v44 = vadd.f32 %v2006_v25, %v664_v41  ;;  %v676_v51 = vmul.f32 0.5, %v662_v37  ;;  %v2353_v37 = vld [vmem:[%s3038_s2 + $0xa8] sm:$0xff]   ;;  %v2785_v41 = vld [vmem:[%s3036_s0 + $0xa0] sm:$0xff]  }
 0x396   :  { %v679_v50 = vmul.f32 0.5, %v673_v39  ;;  %1573 = vadd.xlane.f32.xlu1 %v1568_v42  ;;  %v2355_v39 = vld [vmem:[%s3038_s2 + $0xb8] sm:$0xff]  }
 0x397   :  { %v677_v52 = vmul.f32 0.5, %v665_v44 }
 0x398   :  { %v686_v53 = vpack.c.bf16 %v679_v50, %v678_v48 }
 0x399   :  { %v685_v0 = vpack.c.bf16 %v677_v52, %v676_v51  ;;  %v2229_v1 = vpop.f32.mrb[24].mxu1 }
 0x39a   :  { %v940_v54 = vadd.f32 %v2229_v1, %v2001_v45  ;;  %v931_v55 = vpop.f32.mrb[25].mxu1  ;;  %v2346_v45 = vld [vmem:[%s3038_s2 + $0x80] sm:$0xff]  }
 0x39b   :  { %v932_v56 = vadd.f32 %v1997_v46, %v931_v55  ;;  %2195 = vmatprep.subr.bf16.mxu0 %v685_v0  ;;  %v2230_v57 = vpop.f32.mrb[26].mxu1  ;;  %v2345_v46 = vld [vmem:[%s3036_s0 + $0x58] sm:$0xff]  }
 0x39c   :  { %v948_v59 = vmul.f32 0.5, %v940_v54  ;;  %v943_v60 = vadd.f32 %v2230_v57, %v2002_v47  ;;  %2196 = vmatpush3.bf16.msra.mxu0 %v685_v0  ;;  %v934_v62 = vpop.f32.mrb[27].mxu1  ;;  %v2349_v47 = vld [vmem:[%s3038_s2 + $0x90] sm:$0xff]  }
 0x39d   :  { %v946_v4 = vmul.f32 0.5, %v932_v56  ;;  %v935_v9 = vadd.f32 %v1998_v49, %v934_v62  ;;  %2197 = vmatprep.subr.bf16.mxu0 %v686_v53  ;;  %v2350_v49 = vld [vmem:[%s3036_s0 + $0x78] sm:$0xff]   ;;  %v2357_v62 = vld [vmem:[%s3036_s0 + $0x88] sm:$0xff]  }
 0x39e   :  { %v949_v20 = vmul.f32 0.5, %v943_v60 }
 0x39f   :  { %v947_v23 = vmul.f32 0.5, %v935_v9 }
 0x3a0   :  { %v956_v28 = vpack.c.bf16 %v949_v20, %v948_v59  ;;  %2198 = vmatpush3.bf16.msra.mxu0 %v686_v53  ;;  %v2356_v53 = vld [vmem:[%s3036_s0 + $0x80] sm:$0xff]  }
 0x3a1   :  { %v955_v40 = vpack.c.bf16 %v947_v23, %v946_v4  ;;  %2203 = vmatprep.subr.bf16.mxu0 %v2346_v45 }
 0x3a3   :  { %2200 = vmatmul.mubr.msk.bf16.vlgmr.msra.gmra.mrb[4].mxu0 %vm81_vm0, %v2345_v46  ;;  %2231 = vmatprep.subr.bf16.mxu1 %v955_v40  ;;  %v2360_v46 = vld [vmem:[%s3038_s2 + $0xc0] sm:$0xff]  }
 0x3a4   :  { %2204 = vmatpush3.bf16.msra.mxu0 %v2346_v45  ;;  %2232 = vmatpush3.bf16.msra.mxu1 %v955_v40  ;;  %v2362_v40 = vld [vmem:[%s3038_s2 + $0xd0] sm:$0xff]  }
 0x3a5   :  { %2205 = vmatprep.subr.bf16.mxu0 %v2347_v43  ;;  %2233 = vmatprep.subr.bf16.mxu1 %v956_v28 }
 0x3a8   :  { %2206 = vmatpush3.bf16.msra.mxu0 %v2347_v43  ;;  %2234 = vmatpush3.bf16.msra.mxu1 %v956_v28  ;;  %v2810_v28 = vld [vmem:[%s3036_s0 + $0xa8] sm:$0xff]   ;;  %v2363_v43 = vld [vmem:[%s3038_s2 + $0xd8] sm:$0xff]  }
 0x3a9   :  { %2207 = vmatprep.subr.bf16.mxu0 %v2349_v47 }
 0x3ab   :  { %2236 = vmatmul.mubr.msk.bf16.vlgmr.msra.gmra.mrb[28].mxu1 %vm81_vm0, %v2350_v49  ;;  %v2365_v49 = vld [vmem:[%s3038_s2 + $0xe8] sm:$0xff]  }
 0x3ac   :  { %2208 = vmatpush3.bf16.msra.mxu0 %v2349_v47  ;;  %2243 = vmatprep.mubr.msk.bf16.mxu1 %vm81_vm0, %v2785_v41  ;;  %v2364_v47 = vld [vmem:[%s3038_s2 + $0xe0] sm:$0xff]  }
 0x3ad   :  { %2209 = vmatprep.subr.bf16.mxu0 %v2351_v34 }
 0x3b0   :  { %2210 = vmatpush3.bf16.msra.mxu0 %v2351_v34  ;;  %v2366_v34 = vld [vmem:[%s3038_s2 + $0xf0] sm:$0xff]  }
 0x3b1   :  { %2211 = vmatprep.subr.bf16.mxu0 %v2352_v36 }
 0x3b4   :  { %2212 = vmatpush3.bf16.msra.mxu0 %v2352_v36  ;;  %v2367_v36 = vld [vmem:[%s3038_s2 + $0xf8] sm:$0xff]  }
 0x3b5   :  { %2213 = vmatprep.subr.bf16.mxu0 %v2353_v37 }
 0x3b8   :  { %2214 = vmatpush3.bf16.msra.mxu0 %v2353_v37  ;;  %v2368_v37 = vld [vmem:[%s3036_s0 + $0x90] sm:$0xff]  }
 0x3b9   :  { %2215 = vmatprep.subr.bf16.mxu0 %v2354_v38 }
 0x3bc   :  { %2216 = vmatpush3.bf16.msra.mxu0 %v2354_v38  ;;  %v773_v38 = vsub.s32 2, %v2630_v11 }
 0x3bd   :  { %2217 = vmatprep.subr.bf16.mxu0 %v2355_v39 }
 0x3c0   :  { %2218 = vmatpush3.bf16.msra.mxu0 %v2355_v39  ;;  %v774_v39 = vrot.slane %v2636_v13, %v773_v38 }
 0x3c1   :  { %2267 = vmatprep.subr.bf16.mxu0 %v2550_v31 }
 0x476   :  { %v2201_v42 = vpop.f32.mrb[4].mxu0 }
 0x477   :  { %v737_v44 = vpop.f32.mrb[5].mxu0 }
 0x478   :  { %v2202_v48 = vpop.f32.mrb[6].mxu0 }
 0x479   :  { %v753_v50 = vpack.c.bf16 %v2202_v48, %v2201_v42  ;;  %v740_v51 = vpop.f32.mrb[7].mxu0 }
 0x47a   :  { %v752_v52 = vpack.c.bf16 %v740_v51, %v737_v44 }
 0x47c   :  { %2219 = vmatprep.mubr.bf16.mxu0 %v752_v52 }
 0x47d   :  { %2220 = vmatmul.mubr.bf16.vlgmr.msra.gmra.mrb[8].mxu0 %v753_v50  ;;  %v1582_v50 = vrot.slane %v2642_v19, %v773_v38 }
 0x47e   :  { %2268 = vmatpush3.bf16.msra.mxu0 %v2550_v31  ;;  %v2237_v0 = vpop.f32.mrb[28].mxu1  ;;  %2271 = vmatprep.mubr.msk.bf16.mxu0 %vm81_vm0, %v2356_v53 }
 0x47f   :  { %v1016_v1 = vadd.f32 %v2237_v0, %v2536_v14  ;;  %2269 = vmatprep.subr.bf16.mxu0 %v2548_v30  ;;  %v1007_v54 = vpop.f32.mrb[29].mxu1 }
 0x480   :  { %v1008_v55 = vadd.f32 %v2538_v15, %v1007_v54  ;;  %v2238_v56 = vpop.f32.mrb[30].mxu1 }
 0x481   :  { %v1024_v57 = vmul.f32 0.5, %v1016_v1  ;;  %v1019_v59 = vadd.f32 %v2238_v56, %v2540_v16  ;;  %v1010_v60 = vpop.f32.mrb[31].mxu1 }
 0x482   :  { %v1022_v31 = vmul.f32 0.5, %v1008_v55  ;;  %v1011_v4 = vadd.f32 %v2542_v18, %v1010_v60  ;;  %2270 = vmatpush3.bf16.msra.mxu0 %v2548_v30  ;;  %v2361_v30 = vld [vmem:[%s3038_s2 + $0xc8] sm:$0xff]  }
 0x483   :  { %v1025_v9 = vmul.f32 0.5, %v1019_v59 }
 0x484   :  { %v1023_v45 = vmul.f32 0.5, %v1011_v4 }
 0x485   :  { %v1032_v20 = vpack.c.bf16 %v1025_v9, %v1024_v57  ;;  %2272 = vmatmul.mubr.msk.bf16.vlgmr.msra.gmra.mrb[12].mxu0 %vm81_vm0, %v2357_v62 }
 0x486   :  { %v1031_v23 = vpack.c.bf16 %v1023_v45, %v1022_v31  ;;  %2279 = vmatprep.mubr.msk.bf16.mxu0 %vm81_vm0, %v2368_v37 }
 0x488   :  { %2239 = vmatprep.subr.bf16.mxu1 %v1031_v23 }
 0x489   :  { %2240 = vmatpush3.bf16.msra.mxu1 %v1031_v23 }
 0x48a   :  { %2241 = vmatprep.subr.bf16.mxu1 %v1032_v20 }
 0x48d   :  { %2242 = vmatpush3.bf16.msra.mxu1 %v1032_v20 }
 0x48e   :  { %2247 = vmatprep.subr.bf16.mxu1 %v2360_v46 }
 0x490   :  { %2244 = vmatmul.mubr.msk.bf16.vlgmr.msra.gmra.mrb[32].mxu1 %vm81_vm0, %v2810_v28 }
 0x491   :  { %2248 = vmatpush3.bf16.msra.mxu1 %v2360_v46 }
 0x492   :  { %2249 = vmatprep.subr.bf16.mxu1 %v2361_v30 }
 0x495   :  { %2250 = vmatpush3.bf16.msra.mxu1 %v2361_v30 }
 0x496   :  { %2251 = vmatprep.subr.bf16.mxu1 %v2362_v40 }
 0x499   :  { %2252 = vmatpush3.bf16.msra.mxu1 %v2362_v40 }
 0x49a   :  { %2253 = vmatprep.subr.bf16.mxu1 %v2363_v43 }
 0x49d   :  { %2254 = vmatpush3.bf16.msra.mxu1 %v2363_v43 }
 0x49e   :  { %2255 = vmatprep.subr.bf16.mxu1 %v2364_v47 }
 0x4a1   :  { %2256 = vmatpush3.bf16.msra.mxu1 %v2364_v47 }
 0x4a2   :  { %2257 = vmatprep.subr.bf16.mxu1 %v2365_v49 }
 0x4a5   :  { %2258 = vmatpush3.bf16.msra.mxu1 %v2365_v49 }
 0x4a6   :  { %2259 = vmatprep.subr.bf16.mxu1 %v2366_v34 }
 0x4a9   :  { %2260 = vmatpush3.bf16.msra.mxu1 %v2366_v34 }
 0x4aa   :  { %2261 = vmatprep.subr.bf16.mxu1 %v2367_v36 }
 0x4ad   :  { %2262 = vmatpush3.bf16.msra.mxu1 %v2367_v36 }
 0x550   :  { %v2221_v42 = vpop.f32.mrb[8].mxu0 }
 0x551   :  { %v2841_v44 = vadd.f32 %v2221_v42, %v774_v39  ;;  %v857_v48 = vpop.f32.mrb[9].mxu0 }
 0x552   :  { %v2844_v51 = vadd.f32 %v857_v48, %v774_v39  ;;  %v2222_v52 = vpop.f32.mrb[10].mxu0 }
 0x553   :  { %v3048_v53 = vmax.f32 %v2841_v44, 0.0  ;;  %v2847_v0 = vadd.f32 %v2222_v52, %v774_v39  ;;  %v860_v1 = vpop.f32.mrb[11].mxu0 }
 0x554   :  { %v2849_v54 = vadd.f32 %v860_v1, %v774_v39  ;;  %v872_v55 = vmax.f32 %v2844_v51, 0.0  ;;  %v1119_v39 = vsub.s32 3, %v2630_v11 }
 0x555   :  { %v3045_v56 = vmax.f32 %v2847_v0, 0.0  ;;  %v1585_v57 = vmul.f32 %v1582_v50, %v3048_v53 }
 0x556   :  { %v3053_v59 = vmax.f32 %v2849_v54, 0.0  ;;  %v1583_v9 = vmul.f32 %v1582_v50, %v872_v55  ;;  %v1120_v42 = vrot.slane %v2636_v13, %v1119_v39 }
 0x557   :  { %1591 = vadd.xlane.f32.xlu0 %v1585_v57  ;;  %v1586_v60 = vmul.f32 %v1582_v50, %v3045_v56 }
 0x558   :  { %v2273_v62 = vpop.f32.mrb[12].mxu0  ;;  %v1584_v30 = vmul.f32 %v1582_v50, %v3053_v59 }
 0x559   :  { %v1286_v31 = vadd.f32 %v2273_v62, %v2009_v10  ;;  %v1277_v4 = vpop.f32.mrb[13].mxu0  ;;  %1593 = vadd.xlane.f32.xlu1 %v1586_v60  ;;  %v1598_v62 = vrot.slane %v2642_v19, %v1119_v39  ;;  %v2374_v39 = vld [vmem:[%s3038_s2 + $0x120] sm:$0xff]  }
 0x55a   :  { %v1278_v45 = vadd.f32 %v2005_v12, %v1277_v4  ;;  %v2274_v20 = vpop.f32.mrb[14].mxu0 }
 0x55b   :  { %v1289_v23 = vadd.f32 %v2274_v20, %v2010_v22  ;;  %v1280_v46 = vpop.f32.mrb[15].mxu0  ;;  %1587 = vadd.xlane.f32.xlu0 %v1583_v9  ;;  %v1294_v40 = vmul.f32 0.5, %v1286_v31 }
 0x55c   :  { %v1281_v10 = vadd.f32 %v2006_v25, %v1280_v46  ;;  %v1292_v47 = vmul.f32 0.5, %v1278_v45 }
 0x55d   :  { %v1295_v43 = vmul.f32 0.5, %v1289_v23  ;;  %1589 = vadd.xlane.f32.xlu1 %v1584_v30 }
 0x55e   :  { %v1293_v49 = vmul.f32 0.5, %v1281_v10 }
 0x55f   :  { %v1302_v34 = vpack.c.bf16 %v1295_v43, %v1294_v40 }
 0x560   :  { %v1301_v36 = vpack.c.bf16 %v1293_v49, %v1292_v47 }
 0x562   :  { %2275 = vmatprep.subr.bf16.mxu0 %v1301_v36 }
 0x563   :  { %v2245_v12 = vpop.f32.mrb[32].mxu1  ;;  %2276 = vmatpush3.bf16.msra.mxu0 %v1301_v36 }
 0x564   :  { %v1083_v63 = vpop.f32.mrb[33].mxu1  ;;  %2277 = vmatprep.subr.bf16.mxu0 %v1302_v34 }
 0x565   :  { %v2246_v22 = vpop.f32.mrb[34].mxu1 }
 0x566   :  { %v1099_v37 = vpack.c.bf16 %v2246_v22, %v2245_v12  ;;  %v1086_v38 = vpop.f32.mrb[35].mxu1 }
 0x567   :  { %v1098_v25 = vpack.c.bf16 %v1086_v38, %v1083_v63  ;;  %2278 = vmatpush3.bf16.msra.mxu0 %v1302_v34  ;;  %v2370_v38 = vld [vmem:[%s3038_s2 + $0x100] sm:$0xff]  }
 0x569   :  { %2263 = vmatprep.mubr.bf16.mxu1 %v1098_v25  ;;  %v2372_v25 = vld [vmem:[%s3038_s2 + $0x110] sm:$0xff]  }
 0x56a   :  { %2264 = vmatmul.mubr.bf16.vlgmr.msra.gmra.mrb[36].mxu1 %v1099_v37  ;;  %2280 = vmatmul.mubr.msk.bf16.vlgmr.msra.gmra.mrb[16].mxu0 %vm81_vm0, %v2369_v5  ;;  %v2371_v5 = vld [vmem:[%s3038_s2 + $0x108] sm:$0xff]  }
 0x56b   :  { %2287 = vmatprep.mubr.msk.bf16.mxu0 %vm81_vm0, %v2785_v41 }
 0x63d   :  { %v2265_v48 = vpop.f32.mrb[36].mxu1  ;;  %v2281_v50 = vpop.f32.mrb[16].mxu0 }
 0x63e   :  { %v2878_v52 = vadd.f32 %v2265_v48, %v1120_v42  ;;  %v1362_v1 = vadd.f32 %v2281_v50, %v2536_v14  ;;  %v1203_v57 = vpop.f32.mrb[37].mxu1  ;;  %v1353_v60 = vpop.f32.mrb[17].mxu0  ;;  %v2376_v48 = vld [vmem:[%s3038_s2 + $0x130] sm:$0xff]   ;;  %v2377_v50 = vld [vmem:[%s3038_s2 + $0x138] sm:$0xff]  }
 0x63f   :  { %v2882_v31 = vadd.f32 %v1203_v57, %v1120_v42  ;;  %v1354_v4 = vadd.f32 %v2538_v15, %v1353_v60  ;;  %v2266_v9 = vpop.f32.mrb[38].mxu1  ;;  %v2282_v41 = vpop.f32.mrb[18].mxu0 }
 0x640   :  { %v3046_v45 = vmax.f32 %v2878_v52, 0.0  ;;  %v2886_v20 = vadd.f32 %v2266_v9, %v1120_v42  ;;  %v1365_v23 = vadd.f32 %v2282_v41, %v2540_v16  ;;  %v1356_v46 = vpop.f32.mrb[19].mxu0  ;;  %v1206_v30 = vpop.f32.mrb[39].mxu1  ;;  %v1370_v43 = vmul.f32 0.5, %v1362_v1 }
 0x641   :  { %v1218_v14 = vmax.f32 %v2882_v31, 0.0  ;;  %v1357_v10 = vadd.f32 %v2542_v18, %v1356_v46  ;;  %v2891_v40 = vadd.f32 %v1206_v30, %v1120_v42  ;;  %v1368_v34 = vmul.f32 0.5, %v1354_v4  ;;  %v2375_v42 = vld [vmem:[%s3038_s2 + $0x128] sm:$0xff]  }
 0x642   :  { %v3043_v47 = vmax.f32 %v2886_v20, 0.0  ;;  %v1371_v15 = vmul.f32 0.5, %v1365_v23  ;;  %v1601_v49 = vmul.f32 %v1598_v62, %v3046_v45  ;;  %v1444_v41 = vsub.s32 4, %v2630_v11 }
 0x643   :  { %v1369_v36 = vmul.f32 0.5, %v1357_v10  ;;  %v3051_v12 = vmax.f32 %v2891_v40, 0.0  ;;  %v1599_v18 = vmul.f32 %v1598_v62, %v1218_v14 }
 0x644   :  { %v1373_v16 = vpack.c.bf16 %v1371_v15, %v1370_v43  ;;  %1607 = vadd.xlane.f32.xlu0 %v1601_v49  ;;  %v1602_v63 = vmul.f32 %v1598_v62, %v3043_v47  ;;  %v1445_v23 = vrot.slane %v2636_v13, %v1444_v41  ;;  %v1614_v49 = vrot.slane %v2642_v19, %v1444_v41 }
 0x645   :  { %v1372_v22 = vpack.c.bf16 %v1369_v36, %v1368_v34  ;;  %v1600_v37 = vmul.f32 %v1598_v62, %v3051_v12 }
 0x646   :  { %1609 = vadd.xlane.f32.xlu1 %v1602_v63 }
 0x647   :  { %2283 = vmatprep.subr.bf16.mxu0 %v1372_v22 }
 0x648   :  { %2284 = vmatpush3.bf16.msra.mxu0 %v1372_v22  ;;  %1603 = vadd.xlane.f32.xlu0 %v1599_v18 }
 0x649   :  { %2285 = vmatprep.subr.bf16.mxu0 %v1373_v16 }
 0x64a   :  { %1605 = vadd.xlane.f32.xlu1 %v1600_v37 }
 0x64c   :  { %2286 = vmatpush3.bf16.msra.mxu0 %v1373_v16 }
 0x64d   :  { %2291 = vmatprep.subr.bf16.mxu0 %v2370_v38 }
 0x64f   :  { %2288 = vmatmul.mubr.msk.bf16.vlgmr.msra.gmra.mrb[20].mxu0 %vm81_vm0, %v2810_v28  ;;  %v2373_v28 = vld [vmem:[%s3038_s2 + $0x118] sm:$0xff]   ;;  %s2450_s2 = smov [#allocation2]  }
 0x650   :  { %2292 = vmatpush3.bf16.msra.mxu0 %v2370_v38  ;;  %s1772_s27 = sshll.u32 %s2450_s2, 4  ;;  %s1773_s27 = int_to_ptr.vmem [resolvable:$true] %s1772_s27 }
 0x651   :  { %2293 = vmatprep.subr.bf16.mxu0 %v2371_v5  ;;  %s2426_s28 = scalar_lea.vmem %s1773_s27, 512  ;;  %p2431_p1 = scmp.lt.s32.totalorder %s1773_s27, %s1773_s27 }
 0x652   :  { %p2427_p0 = scmp.ne.s32.totalorder %s1773_s27, %s2426_s28  ;;  %p2432_p2 = scmp.lt.s32.totalorder %s2426_s28, %s2426_s28 }
 0x654   :  { %2294 = vmatpush3.bf16.msra.mxu0 %v2371_v5  ;;  %v1556_v5 = vpop.xlane.xlu0 %1555  ;;  %p2433_p3 = por %p2432_p2, %p2431_p1 }
 0x655   :  { %2295 = vmatprep.subr.bf16.mxu0 %v2372_v25 }
 0x656   :  { %p2434_p4 = pnand %p2433_p3, %p2427_p0 }
 0x658   :  { %2296 = vmatpush3.bf16.msra.mxu0 %v2372_v25  ;;  %v2952_v25 = vpop.xlane.xlu1 %1559 }
 0x659   :  { %2297 = vmatprep.subr.bf16.mxu0 %v2373_v28 }
 0x65c   :  { %2298 = vmatpush3.bf16.msra.mxu0 %v2373_v28  ;;  %v1558_v28 = vpop.xlane.xlu0 %1557 }
 0x65d   :  { %2299 = vmatprep.subr.bf16.mxu0 %v2374_v39 }
 0x660   :  { %2300 = vmatpush3.bf16.msra.mxu0 %v2374_v39  ;;  %v2954_v39 = vpop.xlane.xlu1 %1561 }
 0x661   :  { %2301 = vmatprep.subr.bf16.mxu0 %v2375_v42 }
 0x664   :  { %2302 = vmatpush3.bf16.msra.mxu0 %v2375_v42  ;;  %v2956_v42 = vpop.xlane.xlu0 %1575 }
 0x665   :  { %2303 = vmatprep.subr.bf16.mxu0 %v2376_v48 }
 0x668   :  { %2304 = vmatpush3.bf16.msra.mxu0 %v2376_v48  ;;  %v2958_v48 = vpop.xlane.xlu1 %1577 }
 0x669   :  { %2305 = vmatprep.subr.bf16.mxu0 %v2377_v50  ;;  %v1630_v12 = vmax.f32 %v2954_v39, %v2958_v48 }
 0x66c   :  { %2306 = vmatpush3.bf16.msra.mxu0 %v2377_v50  ;;  %v1572_v50 = vpop.xlane.xlu0 %1571 }
 0x722   :  { %v2289_v1 = vpop.f32.mrb[20].mxu0 }
 0x723   :  { %v1408_v57 = vpop.f32.mrb[21].mxu0 }
 0x724   :  { %v2290_v60 = vpop.f32.mrb[22].mxu0 }
 0x725   :  { %v1424_v62 = vpack.c.bf16 %v2290_v60, %v2289_v1  ;;  %v1411_v4 = vpop.f32.mrb[23].mxu0  ;;  %v1574_v1 = vpop.xlane.xlu1 %1573 }
 0x726   :  { %v1423_v9 = vpack.c.bf16 %v1411_v4, %v1408_v57  ;;  %v2960_v57 = vpop.xlane.xlu0 %1591 }
 0x728   :  { %2307 = vmatprep.mubr.bf16.mxu0 %v1423_v9 }
 0x729   :  { %2308 = vmatmul.mubr.bf16.vlgmr.msra.gmra.mrb[24].mxu0 %v1424_v62  ;;  %v2962_v60 = vpop.xlane.xlu1 %1593 }
 0x72a   :  { %v1588_v62 = vpop.xlane.xlu0 %1587 }
 0x72d   :  { %v1590_v4 = vpop.xlane.xlu1 %1589 }
 0x72e   :  { %v2964_v9 = vpop.xlane.xlu0 %1607 }
 0x731   :  { %v2966_v41 = vpop.xlane.xlu1 %1609 }
 0x7fc   :  { %v2309_v46 = vpop.f32.mrb[24].mxu0 }
 0x7fd   :  { %v1528_v30 = vpop.f32.mrb[25].mxu0  ;;  %v2931_v10 = vadd.f32 %v2309_v46, %v1445_v23  ;;  %v1604_v46 = vpop.xlane.xlu0 %1603 }
 0x7fe   :  { %v2933_v43 = vadd.f32 %v1528_v30, %v1445_v23  ;;  %v2310_v15 = vpop.f32.mrb[26].mxu0 }
 0x7ff   :  { %v1531_v34 = vpop.f32.mrb[27].mxu0  ;;  %v2937_v16 = vadd.f32 %v2310_v15, %v1445_v23  ;;  %v3044_v11 = vmax.f32 %v2931_v10, 0.0  ;;  %v1629_v15 = vmax.f32 %v2952_v25, %v2956_v42 }
 0x800   :  { %v3052_v36 = vmax.f32 %v2933_v43, 0.0  ;;  %v2939_v63 = vadd.f32 %v1531_v34, %v1445_v23  ;;  %v1627_v23 = vmax.f32 %v1556_v5, %v1572_v50  ;;  %v1606_v34 = vpop.xlane.xlu1 %1605 }
 0x801   :  { %v3042_v22 = vmax.f32 %v2937_v16, 0.0  ;;  %v1617_v37 = vmul.f32 %v1614_v49, %v3044_v11 }
 0x802   :  { %v3047_v13 = vmax.f32 %v2939_v63, 0.0  ;;  %v1615_v18 = vmul.f32 %v1614_v49, %v3052_v36  ;;  %v1631_v30 = vmax.f32 %v1627_v23, %v1588_v62 }
 0x803   :  { %v1618_v38 = vmul.f32 %v1614_v49, %v3042_v22 }
 0x804   :  { %1619 = vadd.xlane.f32.xlu0 %v1615_v18  ;;  %v1616_v19 = vmul.f32 %v1614_v49, %v3047_v13  ;;  %v1628_v49 = vmax.f32 %v1558_v28, %v1574_v1  ;;  %v1635_v18 = vmax.f32 %v1631_v30, %v1604_v46 }
 0x806   :  { %1621 = vadd.xlane.f32.xlu1 %v1616_v19  ;;  %v1633_v19 = vmax.f32 %v1629_v15, %v2960_v57 }
 0x808   :  { %1623 = vadd.xlane.f32.xlu0 %v1617_v37  ;;  %v1632_v37 = vmax.f32 %v1628_v49, %v1590_v4  ;;  %v1637_v47 = vmax.f32 %v1633_v19, %v2964_v9  ;;  %v1634_v19 = vmax.f32 %v1630_v12, %v2962_v60 }
 0x80a   :  { %1625 = vadd.xlane.f32.xlu1 %v1618_v38  ;;  %v1636_v11 = vmax.f32 %v1632_v37, %v1606_v34 }
 0x891   :  { %v1620_v38 = vpop.xlane.xlu0 %1619 }
 0x892   :  { %v1639_v22 = vmax.f32 %v1635_v18, %v1620_v38 }
 0x893   :  { %v1622_v56 = vpop.xlane.xlu1 %1621 }
 0x894   :  { %v1643_v45 = vsub.f32 %v1556_v5, %v1639_v22  ;;  %v1655_v13 = vsub.f32 %v1572_v50, %v1639_v22  ;;  %v1667_v53 = vsub.f32 %v1588_v62, %v1639_v22  ;;  %v1679_v8 = vsub.f32 %v1604_v46, %v1639_v22 }
 0x895   :  { %v1640_v23 = vmax.f32 %v1636_v11, %v1622_v56  ;;  %v1624_v33 = vpop.xlane.xlu0 %1623  ;;  %v1691_v49 = vsub.f32 %v1620_v38, %v1639_v22  ;;  %v1638_v46 = vmax.f32 %v1634_v19, %v2966_v41 }
 0x896   :  { %v1647_v36 = vmul.f32 1.442695, %v1643_v45  ;;  %v1659_v30 = vmul.f32 1.442695, %v1655_v13  ;;  %v1641_v59 = vmax.f32 %v1637_v47, %v1624_v33  ;;  %v1671_v15 = vmul.f32 1.442695, %v1667_v53 }
 0x897   :  { %v1644_v2 = vsub.f32 %v1558_v28, %v1640_v23  ;;  %v1656_v18 = vsub.f32 %v1574_v1, %v1640_v23  ;;  %v1683_v37 = vmul.f32 1.442695, %v1679_v8  ;;  %v1668_v5 = vsub.f32 %v1590_v4, %v1640_v23  ;;  %v1626_v11 = vpop.xlane.xlu1 %1625 }
 0x898   :  { %2378 = vpow2.f32 %v1647_v36  ;;  %v1680_v62 = vsub.f32 %v1606_v34, %v1640_v23  ;;  %v1645_v45 = vsub.f32 %v2952_v25, %v1641_v59  ;;  %v1695_v47 = vmul.f32 1.442695, %v1691_v49 }
 0x899   :  { %2380 = vpow2.f32 %v1659_v30  ;;  %v1649_v50 = vmul.f32 1.442695, %v1644_v2  ;;  %v1661_v26 = vmul.f32 1.442695, %v1656_v18  ;;  %v1657_v53 = vsub.f32 %v2956_v42, %v1641_v59 }
 0x89a   :  { %2382 = vpow2.f32 %v1671_v15  ;;  %v1673_v13 = vmul.f32 1.442695, %v1668_v5  ;;  %v1692_v22 = vsub.f32 %v1622_v56, %v1640_v23  ;;  %v1642_v12 = vmax.f32 %v1638_v46, %v1626_v11 }
 0x89b   :  { %2384 = vpow2.f32 %v1683_v37  ;;  %v1685_v8 = vmul.f32 1.442695, %v1680_v62  ;;  %v1669_v36 = vsub.f32 %v2960_v57, %v1641_v59  ;;  %v1651_v2 = vmul.f32 1.442695, %v1645_v45 }
 0x89c   :  { %2386 = vpow2.f32 %v1649_v50  ;;  %v1681_v28 = vsub.f32 %v2964_v9, %v1641_v59  ;;  %v1663_v1 = vmul.f32 1.442695, %v1657_v53  ;;  %v1646_v25 = vsub.f32 %v2954_v39, %v1642_v12 }
 0x89d   :  { %2388 = vpow2.f32 %v1661_v26  ;;  %v1697_v4 = vmul.f32 1.442695, %v1692_v22  ;;  %v1693_v34 = vsub.f32 %v1624_v33, %v1641_v59  ;;  %v1658_v42 = vsub.f32 %v2958_v48, %v1642_v12 }
 0x89e   :  { %2390 = vpow2.f32 %v1695_v47  ;;  %v1675_v56 = vmul.f32 1.442695, %v1669_v36  ;;  %v1687_v23 = vmul.f32 1.442695, %v1681_v28  ;;  %v1670_v57 = vsub.f32 %v2962_v60, %v1642_v12 }
 0x89f   :  { %2392 = vpow2.f32 %v1673_v13  ;;  %v1653_v30 = vmul.f32 1.442695, %v1646_v25  ;;  %v1682_v9 = vsub.f32 %v2966_v41, %v1642_v12  ;;  %v1699_v39 = vmul.f32 1.442695, %v1693_v34 }
 0x8a0   :  { %2394 = vpow2.f32 %v1685_v8  ;;  %v1665_v49 = vmul.f32 1.442695, %v1658_v42  ;;  %v1694_v48 = vsub.f32 %v1626_v11, %v1642_v12  ;;  %v1677_v37 = vmul.f32 1.442695, %v1670_v57 }
 0x8a1   :  { %2396 = vpow2.f32 %v1651_v2  ;;  %v1689_v41 = vmul.f32 1.442695, %v1682_v9  ;;  %v3058_v42 = vmax.f32 %v2849_v54, 0.0  ;;  %v3061_v54 = vmax.f32 %v2650_v27, 0.0 }
 0x8a2   :  { %v2379_v38 = vpop.eup %2378  ;;  %2398 = vpow2.f32 %v1663_v1  ;;  %v1701_v24 = vmul.f32 1.442695, %v1694_v48  ;;  %v3062_v48 = vmax.f32 %v2709_v3, 0.0  ;;  %v3065_v3 = vmax.f32 %v2878_v52, 0.0 }
 0x8a3   :  { %v2381_v26 = vpop.eup %2380  ;;  %2400 = vpow2.f32 %v1697_v4  ;;  %v1723_v33 = vmul.f32 %v2379_v38, %v332_v29 }
 0x8a4   :  { %v1703_v15 = vadd.f32 %v2381_v26, %v2379_v38  ;;  %v2383_v18 = vpop.eup %2382  ;;  %v1727_v59 = vmul.f32 %v2381_v26, %v602_v7  ;;  %2402 = vpow2.f32 %v1675_v56 }
 0x8a5   :  { %v2385_v19 = vpop.eup %2384  ;;  %2404 = vpow2.f32 %v1687_v23  ;;  %v1735_v13 = vmul.f32 %v2383_v18, %v872_v55  ;;  %v3057_v55 = vmax.f32 %v2698_v58, 0.0  ;;  %v3060_v58 = vmax.f32 %v2891_v40, 0.0 }
 0x8a6   :  { %v1707_v60 = vadd.f32 %v2383_v18, %v1703_v15  ;;  %v2387_v5 = vpop.eup %2386  ;;  %2406 = vpow2.f32 %v1653_v30  ;;  %v1731_v45 = vadd.f32 %v1727_v59, %v1723_v33 }
 0x8a7   :  { %v2389_v50 = vpop.eup %2388  ;;  %2408 = vpow2.f32 %v1665_v49  ;;  %v1724_v7 = vmul.f32 %v2387_v5, %v333_v35  ;;  %v1743_v35 = vmul.f32 %v2385_v19, %v1218_v14  ;;  %v3059_v14 = vmax.f32 %v2933_v43, 0.0 }
 0x8a8   :  { %v1711_v62 = vadd.f32 %v2385_v19, %v1707_v60  ;;  %v2391_v46 = vpop.eup %2390  ;;  %v1704_v47 = vadd.f32 %v2389_v50, %v2387_v5  ;;  %2410 = vpow2.f32 %v1699_v39  ;;  %v1728_v11 = vmul.f32 %v2389_v50, %v603_v17 }
 0x8a9   :  { %v2393_v29 = vpop.eup %2392  ;;  %2412 = vpow2.f32 %v1677_v37  ;;  %v1739_v36 = vadd.f32 %v1735_v13, %v1731_v45  ;;  %v3056_v17 = vmax.f32 %v2644_v21, 0.0  ;;  %v1751_v15 = vmul.f32 %v2391_v46, %v3059_v14 }
 0x8aa   :  { %v1715_v61 = vadd.f32 %v2391_v46, %v1711_v62  ;;  %v2395_v53 = vpop.eup %2394  ;;  %v1708_v22 = vadd.f32 %v2393_v29, %v1704_v47  ;;  %2414 = vpow2.f32 %v1689_v41  ;;  %v1732_v1 = vadd.f32 %v1728_v11, %v1724_v7 }
 0x8ab   :  { %v2397_v12 = vpop.eup %2396  ;;  %v1736_v56 = vmul.f32 %v2393_v29, %v3058_v42  ;;  %v1747_v57 = vadd.f32 %v1743_v35, %v1739_v36  ;;  %v1744_v18 = vmul.f32 %v2395_v53, %v3060_v58  ;;  %v3063_v5 = vmax.f32 %v2841_v44, 0.0 }
 0x8ac   :  { %2416 = vrcp.f32 %v1715_v61  ;;  %v2399_v8 = vpop.eup %2398  ;;  %v1712_v2 = vadd.f32 %v2395_v53, %v1708_v22  ;;  %v1725_v51 = vmul.f32 %v2397_v12, %v3056_v17  ;;  %v3066_v44 = vmax.f32 %v2847_v0, 0.0 }
 0x8ad   :  { %v2401_v28 = vpop.eup %2400  ;;  %v1705_v25 = vadd.f32 %v2399_v8, %v2397_v12  ;;  %2418 = vpow2.f32 %v1701_v24  ;;  %v1729_v4 = vmul.f32 %v2399_v8, %v3057_v55  ;;  %v1740_v30 = vadd.f32 %v1736_v56, %v1732_v1 }
 0x8ae   :  { %v2403_v32 = vpop.eup %2402  ;;  %v1716_v6 = vadd.f32 %v2401_v28, %v1712_v2  ;;  %v1755_v37 = vadd.f32 %v1751_v15, %v1747_v57  ;;  %v3064_v24 = vmax.f32 %v2939_v63, 0.0  ;;  %v3067_v36 = vmax.f32 %v2931_v10, 0.0 }
 0x8af   :  { %v2405_v34 = vpop.eup %2404  ;;  %v1709_v38 = vadd.f32 %v2403_v32, %v1705_v25  ;;  %v1733_v21 = vadd.f32 %v1729_v4, %v1725_v51  ;;  %v1737_v41 = vmul.f32 %v2403_v32, %v3063_v5  ;;  %v1748_v62 = vadd.f32 %v1744_v18, %v1740_v30 }
 0x8b0   :  { %v2407_v23 = vpop.eup %2406  ;;  %2420 = vrcp.f32 %v1716_v6  ;;  %v1752_v27 = vmul.f32 %v2401_v28, %v3064_v24  ;;  %v1745_v61 = vmul.f32 %v2405_v34, %v3065_v3  ;;  %v3068_v63 = vmax.f32 %v2886_v20, 0.0 }
 0x8b1   :  { %v2409_v26 = vpop.eup %2408  ;;  %v1713_v9 = vadd.f32 %v2405_v34, %v1709_v38  ;;  %v1726_v59 = vmul.f32 %v2407_v23, %v3061_v54  ;;  %v1741_v46 = vadd.f32 %v1737_v41, %v1733_v21  ;;  %v3069_v35 = vmax.f32 %v2937_v16, 0.0 }
 0x8b2   :  { %v2411_v31 = vpop.eup %2410  ;;  %v1706_v39 = vadd.f32 %v2409_v26, %v2407_v23  ;;  %v1730_v19 = vmul.f32 %v2409_v26, %v3062_v48  ;;  %v1756_v11 = vadd.f32 %v1752_v27, %v1748_v62 }
 0x8b3   :  { %v2413_v49 = vpop.eup %2412  ;;  %v1717_v33 = vadd.f32 %v2411_v31, %v1713_v9  ;;  %v1749_v22 = vadd.f32 %v1745_v61, %v1741_v46  ;;  %v1753_v2 = vmul.f32 %v2411_v31, %v3067_v36 }
 0x8b4   :  { %v2415_v60 = vpop.eup %2414  ;;  %v1710_v43 = vadd.f32 %v2413_v49, %v1706_v39  ;;  %v1734_v29 = vadd.f32 %v1730_v19, %v1726_v59  ;;  %v1738_v53 = vmul.f32 %v2413_v49, %v3066_v44 }
 0x8b5   :  { %2422 = vrcp.f32 %v1717_v33  ;;  %v1746_v28 = vmul.f32 %v2415_v60, %v3068_v63  ;;  %v1757_v52 = vadd.f32 %v1753_v2, %v1749_v22 }
 0x8b6   :  { %v2417_v50 = vpop.eup %2416  ;;  %v1714_v45 = vadd.f32 %v2415_v60, %v1710_v43  ;;  %v1742_v12 = vadd.f32 %v1738_v53, %v1734_v29 }
 0x8b7   :  { %v1759_v40 = vmul.f32 %v2417_v50, %v1755_v37  ;;  %v2419_v47 = vpop.eup %2418 }
 0x8b8   :  { %v1718_v7 = vadd.f32 %v2419_v47, %v1714_v45  ;;  %v1750_v25 = vadd.f32 %v1746_v28, %v1742_v12  ;;  %v1754_v0 = vmul.f32 %v2419_v47, %v3069_v35 }
 0x8b9   :  { %1763 = vst [vmem:[#allocation2] sm:$0xff] %v1759_v40 }
 0x8ba   :  { %v2421_v13 = vpop.eup %2420  ;;  %2424 = vrcp.f32 %v1718_v7  ;;  %v1758_v6 = vadd.f32 %v1754_v0, %v1750_v25 }
 0x8bb   :  { %v1760_v8 = vmul.f32 %v2421_v13, %v1756_v11 }
 0x8bd   :  { %1764 = vst [vmem:[#allocation2 + $0x8] sm:$0xff] %v1760_v8 }
 0x8bf   :  { %v2423_v1 = vpop.eup %2422 }
 0x8c0   :  { %v1761_v32 = vmul.f32 %v2423_v1, %v1757_v52 }
 0x8c2   :  { %1765 = vst [vmem:[#allocation2 + $0x10] sm:$0xff] %v1761_v32 }
 0x8c4   :  { %v2425_v17 = vpop.eup %2424 }
 0x8c5   :  { %v1762_v51 = vmul.f32 %v2425_v17, %v1758_v6 }
 0x8c7   :  { %1766 = vst [vmem:[#allocation2 + $0x18] sm:$0xff] %v1762_v51 }
 0x8c8   :  { %2437 = shalt.err (!%p2434_p4)
}
 0x8c9   :  { %s2438_s6 = scalar_lea.hbm %s3041_s5, 512 }
 0x8ca   :  { %p2439_p5 = scmp.ne.s32.totalorder %s3041_s5, %s2438_s6  ;;  %p2442_p6 = scmp.lt.u32.totalorder %s2438_s6, %s3041_s5 }
 0x8cc   :  { %p2444_p7 = pnand %p2442_p6, %p2439_p5 }
 0x8ce   :  { %2447 = shalt.err (!%p2444_p7)
}
 0x8cf   :  { %s2451_s9 = smov 128   ;;  %s2452_s10 = smov 8  }
 0x8d0   :  { %1778 = dma.vmem_to_hbm [thread:$0]  %s1773_s27, 512, %s3041_s5, [#allocation3], %s2451_s9, %s2451_s9, %s2452_s10  }
 0x8d1   :  { %2448 = dma.done.wait [#allocation3], 512  }
 0x8d2   :  { %2449 = vsyncadd [#allocation3], 4294966784 }
 0x8d3   :  { %1782 = vsyncpa [#allocation3], 1 }

</bundles_post_ra>
